<compile_context>
chip_gen: v7x
topology: tpu7x:2x2x1
jax: 0.10.0
libtpu: 0.0.40
codegen_flags: <defaults>
</compile_context>

<pallas_src>
import functools

import jax
import jax.numpy as jnp
from jax.experimental import pallas as pl
from jax.experimental.pallas import tpu as pltpu


def lstm_kernel(
    x_ref,      # (T*B, I)   time-major flattened input, compute dtype
    wih0_ref,   # (I, 4H)    layer-0 input weights^T, i/f/o columns pre-scaled by 0.5
    b0_ref,     # (1, 4H)    b_ih0 + b_hh0, i/f/o entries pre-scaled by 0.5 (f32)
    wbig_ref,   # (2H, 8H)   [ [wih1^T ; whh1^T] | [whh0^T ; 0] ], i/f/o cols *0.5
    b1_ref,     # (1, 4H)    b_ih1 + b_hh1, i/f/o entries *0.5 (f32)
    wfc_ref,    # (H, 128)   fc weight^T zero-padded to 128 lanes
    bfc_ref,    # (1, 128)   fc bias zero-padded to 128 lanes (f32)
    out_ref,    # (B, 128)   lane-dense output; caller slices [:, :4]
    xh_ref,     # (B, 2H)    f32 scratch holding [ h1_t | h2_{t-1} ]
    *,
    T, B, H,
):
    cd = wbig_ref.dtype   # MXU operand dtype (bf16 by default, f32 optional)

    # ---- hoisted layer-0 input projection: every time step in one MXU call ----
    gx = (
        jnp.dot(x_ref[...], wih0_ref[...], preferred_element_type=jnp.float32)
        + b0_ref[...]
    )  # (T*B, 4H) f32; i/f/o columns already carry the 0.5 prescale

    wbig = wbig_ref[...]   # (2H, 8H)
    b1 = b1_ref[...]       # (1, 4H)

    def activate(gates, c_prev):
        # i/f/o pre-activations were scaled by 0.5 in the packed weights, so
        # sigmoid(z) = 0.5*(1 + tanh(z/2)) needs only this single tanh EUP pass
        # over the full 128-lane gate vreg; the affine recovery is cheap VPU work.
        t = jnp.tanh(gates)
        i = 0.5 * (1.0 + t[:, 0 * H:1 * H])
        f = 0.5 * (1.0 + t[:, 1 * H:2 * H])
        g = t[:, 2 * H:3 * H]                      # g gate: plain tanh, unscaled
        o = 0.5 * (1.0 + t[:, 3 * H:4 * H])
        c_new = f * c_prev + i * g
        h_new = o * jnp.tanh(c_new)
        return h_new, c_new

    c1 = jnp.zeros((B, H), jnp.float32)
    c2 = jnp.zeros((B, H), jnp.float32)
    h2 = jnp.zeros((B, H), jnp.float32)
    xh_ref[...] = jnp.zeros((B, 2 * H), jnp.float32)   # h1_{-1} = h2_{-1} = 0
    rec0 = None   # layer-0 recurrent term h1_{t-1} @ whh0^T (zero for t=0)

    # ---- fully-unrolled time recurrence (T is small & static) ----
    # TODO(synk): for large T switch to lax.fori_loop(..., unroll=4..8) with
    # gx[pl.ds(pl.multiple_of(t*B, B), B)] indexing instead of a full unroll.
    for t in range(T):
        # layer 0: only the (already-computed) recurrent term add remains here.
        g0 = gx[t * B:(t + 1) * B, :]
        if rec0 is not None:
            g0 = g0 + rec0
        h1, c1 = activate(g0, c1)

        # assemble [h1_t | h2_{t-1}] via plain stores into the persistent scratch
        # (no lane-concat / XLU rotate on the serial critical path).
        xh_ref[:, 0:H] = h1

        # ONE fused MXU call per step (256 output lanes):
        #   lanes 0:4H  -> layer-1 gates for step t
        #   lanes 4H:8H -> layer-0 recurrent term for step t+1 (h1_t @ whh0^T)
        big = jnp.dot(xh_ref[...].astype(cd), wbig,
                      preferred_element_type=jnp.float32)      # (B, 8H) f32
        g1 = big[:, 0:4 * H] + b1
        rec0 = big[:, 4 * H:8 * H]          # unused (dead lanes) on the last step

        h2, c2 = activate(g1, c2)
        if t + 1 < T:
            xh_ref[:, H:2 * H] = h2         # becomes h2_{t-1} for the next step

    # ---- final linear on the last top-layer hidden state ----
    # wfc/bfc are zero-padded to 128 lanes -> unmasked, lane-dense store.
    out_ref[...] = (
        jnp.dot(h2.astype(cd), wfc_ref[...], preferred_element_type=jnp.float32)
        + bfc_ref[...]
    )


def pack_params(params, *, hidden_size=32, use_bf16=True):
    """One-time packing of PyTorch-layout LSTM/Linear params into kernel layout.

    Call ONCE at parameter-load time (not per forward): all transposes, weight
    stacking, bias sums, the 0.5 i/f/o gate prescale (sigmoid-via-tanh trick),
    bf16 casts and fc lane-padding happen here, off the per-call path.
    """
    H = hidden_size
    cd = jnp.bfloat16 if use_bf16 else jnp.float32
    (wih0, whh0, bih0, bhh0, wih1, whh1, bih1, bhh1, wfc, bfc) = params

    # 0.5 prescale on i/f/o gate columns only (PyTorch gate order [i, f, g, o]).
    scale = jnp.concatenate([
        jnp.full((H,), 0.5, jnp.float32),
        jnp.full((H,), 0.5, jnp.float32),
        jnp.ones((H,), jnp.float32),
        jnp.full((H,), 0.5, jnp.float32),
    ])                                                                   # (4H,)

    wih0_t = (wih0.T * scale[None, :]).astype(cd)                        # (I, 4H)
    b0 = ((bih0 + bhh0) * scale).reshape(1, 4 * H).astype(jnp.float32)   # (1, 4H)

    whh0_t = whh0.T * scale[None, :]                                     # (H, 4H)
    w1 = jnp.concatenate([wih1.T, whh1.T], axis=0) * scale[None, :]      # (2H, 4H)
    b1 = ((bih1 + bhh1) * scale).reshape(1, 4 * H).astype(jnp.float32)   # (1, 4H)

    # fused per-step weight: [ w1 | [whh0^T ; 0] ] -> (2H, 8H) = (64, 256)
    wbig = jnp.concatenate(
        [w1, jnp.concatenate([whh0_t, jnp.zeros((H, 4 * H), jnp.float32)], axis=0)],
        axis=1,
    ).astype(cd)

    # lane-dense fc: zero-pad the 4 output columns to a full 128-lane vreg.
    wfc_pad = jnp.zeros((H, 128), jnp.float32).at[:, :4].set(wfc.T).astype(cd)
    bfc_pad = jnp.zeros((1, 128), jnp.float32).at[:, :4].set(bfc.reshape(1, 4))

    return (wih0_t, b0, wbig, b1, wfc_pad, bfc_pad)


@functools.partial(jax.jit, static_argnames=("hidden_size",))
def lstm_model_forward(x, packed, *, hidden_size=32):
    """Forward pass of LSTMModel: fc(lstm(x)[:, -1, :]) -> (B, 4).

    `packed` comes from pack_params(); its dtype selects bf16 vs f32 MXU operands
    (accumulation and recurrence state are always f32).
    """
    wih0_t, b0, wbig, b1, wfc_pad, bfc_pad = packed
    B, T, I = x.shape
    H = hidden_size
    cd = wih0_t.dtype

    # Time-major + flatten so the layer-0 input projection is one (T*B, I) @ (I, 4H)
    # matmul; row t*B + b == (time t, batch b).  This is the only per-call prep op.
    x_tm = jnp.transpose(x, (1, 0, 2)).reshape(T * B, I).astype(cd)

    kernel = functools.partial(lstm_kernel, T=T, B=B, H=H)
    vmem = pl.BlockSpec(memory_space=pltpu.MemorySpace.VMEM)  # fully VMEM-resident

    # TODO(synk): at production batch sizes add a leading "parallel" batch grid axis
    # (dimension_semantics=("parallel", ...)) so both v7x TensorCores are used, and
    # chunk the hoisted input projection over T once the (T*B, 4H) slab approaches the
    # scoped-VMEM limit; at B=2 / T=8 a grid-less call is optimal on all generations.
    out = pl.pallas_call(
        kernel,
        out_shape=jax.ShapeDtypeStruct((B, 128), jnp.float32),
        in_specs=[vmem] * 7,
        out_specs=vmem,
        scratch_shapes=[pltpu.VMEM((B, 2 * H), jnp.float32)],
    )(x_tm, wih0_t, b0, wbig, b1, wfc_pad, bfc_pad)

    return out[:, :4]


def lstm_model_reference(x, params, *, hidden_size=32):
    """Pure-JAX reference with PyTorch LSTM semantics (for correctness check)."""
    B, T, _ = x.shape
    H = hidden_size
    (wih0, whh0, bih0, bhh0, wih1, whh1, bih1, bhh1, wfc, bfc) = params

    def cell(x_t, h, c, wih, whh, bih, bhh):
        gates = x_t @ wih.T + h @ whh.T + bih + bhh
        i = jax.nn.sigmoid(gates[:, 0 * H:1 * H])
        f = jax.nn.sigmoid(gates[:, 1 * H:2 * H])
        g = jnp.tanh(gates[:, 2 * H:3 * H])
        o = jax.nn.sigmoid(gates[:, 3 * H:4 * H])
        c = f * c + i * g
        h = o * jnp.tanh(c)
        return h, c

    h1 = c1 = h2 = c2 = jnp.zeros((B, H), jnp.float32)
    for t in range(T):
        h1, c1 = cell(x[:, t, :], h1, c1, wih0, whh0, bih0, bhh0)
        # inter-layer dropout is identity at inference
        h2, c2 = cell(h1, h2, c2, wih1, whh1, bih1, bhh1)
    return h2 @ wfc.T + bfc


def init_params(key, input_size, hidden_size=32):
    """Deterministic init matching PyTorch LSTM/Linear parameter shapes."""
    H = hidden_size
    k = 1.0 / jnp.sqrt(H)
    keys = jax.random.split(key, 10)
    u = lambda kk, shape: jax.random.uniform(kk, shape, jnp.float32, -k, k)
    return (
        u(keys[0], (4 * H, input_size)),  # weight_ih_l0
        u(keys[1], (4 * H, H)),           # weight_hh_l0
        u(keys[2], (4 * H,)),             # bias_ih_l0
        u(keys[3], (4 * H,)),             # bias_hh_l0
        u(keys[4], (4 * H, H)),           # weight_ih_l1
        u(keys[5], (4 * H, H)),           # weight_hh_l1
        u(keys[6], (4 * H,)),             # bias_ih_l1
        u(keys[7], (4 * H,)),             # bias_hh_l1
        u(keys[8], (4, H)),               # fc.weight
        u(keys[9], (4,)),                 # fc.bias
    )


if __name__ == "__main__":
    B, T, I, H = 2, 8, 8, 32
    key = jax.random.PRNGKey(0)
    kx, kp = jax.random.split(key)
    x = jax.random.normal(kx, (B, T, I), dtype=jnp.float32)
    params = init_params(kp, I, H)

    ref = lstm_model_reference(x, params, hidden_size=H)

    # f32 MXU-operand path: tight check (sigmoid-via-tanh rewrite is exact).
    packed_f32 = pack_params(params, hidden_size=H, use_bf16=False)
    out_f32 = jax.block_until_ready(lstm_model_forward(x, packed_f32, hidden_size=H))
    assert out_f32.shape == (B, 4) and out_f32.dtype == jnp.float32
    assert bool(jnp.allclose(out_f32, ref, rtol=2e-3, atol=2e-3)), (out_f32, ref)

    # bf16 MXU-operand path (default): f32 accumulation/state, looser tolerance.
    packed_bf16 = pack_params(params, hidden_size=H, use_bf16=True)
    out_bf16 = jax.block_until_ready(lstm_model_forward(x, packed_bf16, hidden_size=H))
    assert out_bf16.shape == (B, 4) and out_bf16.dtype == jnp.float32
    assert bool(jnp.allclose(out_bf16, ref, rtol=4e-2, atol=4e-2)), (out_bf16, ref)

    print("KERNEL_OK")
</pallas_src>

<mosaic_0001>
module attributes {stable_mosaic.version = 11 : i64} {
  func.func @lstm_kernel(%arg0: memref<16x8xf32, #tpu.memory_space<vmem>>, %arg1: memref<8x128xf32, #tpu.memory_space<vmem>>, %arg2: memref<1x128xf32, #tpu.memory_space<vmem>>, %arg3: memref<64x256xf32, #tpu.memory_space<vmem>>, %arg4: memref<1x128xf32, #tpu.memory_space<vmem>>, %arg5: memref<32x128xf32, #tpu.memory_space<vmem>>, %arg6: memref<1x128xf32, #tpu.memory_space<vmem>>, %arg7: memref<2x128xf32, #tpu.memory_space<vmem>>, %arg8: memref<2x64xf32, #tpu.memory_space<vmem>>) attributes {dimension_semantics = [], scalar_prefetch = 0 : i64, scratch_operands = 1 : i64, tpu.core_type = #tpu.core_type<tc>} {
    %c0 = arith.constant 0 : index
    %c0_0 = arith.constant 0 : index
    %0 = vector.load %arg0[%c0, %c0_0] : memref<16x8xf32, #tpu.memory_space<vmem>>, vector<16x8xf32>
    %c0_1 = arith.constant 0 : index
    %c0_2 = arith.constant 0 : index
    %1 = vector.load %arg1[%c0_1, %c0_2] : memref<8x128xf32, #tpu.memory_space<vmem>>, vector<8x128xf32>
    %cst = arith.constant dense<0.000000e+00> : vector<16x128xf32>
    %2 = tpu.matmul %0, %1, %cst {dimension_numbers = #tpu.dot_dimension_numbers<[1], [0], [0], [1], [0, 0, 1, 1], [], []>} : vector<16x8xf32>, vector<8x128xf32>, vector<16x128xf32> -> vector<16x128xf32>
    %c0_3 = arith.constant 0 : index
    %c0_4 = arith.constant 0 : index
    %3 = vector.load %arg2[%c0_3, %c0_4] : memref<1x128xf32, #tpu.memory_space<vmem>>, vector<1x128xf32>
    %4 = vector.broadcast %3 : vector<1x128xf32> to vector<16x128xf32>
    %5 = arith.addf %2, %4 : vector<16x128xf32>
    %c0_5 = arith.constant 0 : index
    %c0_6 = arith.constant 0 : index
    %6 = vector.load %arg3[%c0_5, %c0_6] : memref<64x256xf32, #tpu.memory_space<vmem>>, vector<64x256xf32>
    %c0_7 = arith.constant 0 : index
    %c0_8 = arith.constant 0 : index
    %7 = vector.load %arg4[%c0_7, %c0_8] : memref<1x128xf32, #tpu.memory_space<vmem>>, vector<1x128xf32>
    %cst_9 = arith.constant 0.000000e+00 : f32
    %8 = vector.broadcast %cst_9 : f32 to vector<2x32xf32>
    %cst_10 = arith.constant 0.000000e+00 : f32
    %9 = vector.broadcast %cst_10 : f32 to vector<2x32xf32>
    %cst_11 = arith.constant 0.000000e+00 : f32
    %10 = vector.broadcast %cst_11 : f32 to vector<2x64xf32>
    %c0_12 = arith.constant 0 : index
    %c0_13 = arith.constant 0 : index
    %11 = vector.load %arg8[%c0_12, %c0_13] : memref<2x64xf32, #tpu.memory_space<vmem>>, vector<2x64xf32>
    tpu.vector_store %arg8[%c0_12, %c0_13], %10 {strides = array<i32>} : memref<2x64xf32, #tpu.memory_space<vmem>>, vector<2x64xf32>,
    %12 = vector.extract_strided_slice %5 {offsets = [0, 0], sizes = [2, 128], strides = [1, 1]} : vector<16x128xf32> to vector<2x128xf32>
    %13 = math.tanh %12 : vector<2x128xf32>
    %14 = vector.extract_strided_slice %13 {offsets = [0, 0], sizes = [2, 32], strides = [1, 1]} : vector<2x128xf32> to vector<2x32xf32>
    %cst_14 = arith.constant 1.000000e+00 : f32
    %15 = vector.broadcast %cst_14 : f32 to vector<2x32xf32>
    %16 = arith.addf %15, %14 : vector<2x32xf32>
    %cst_15 = arith.constant 5.000000e-01 : f32
    %17 = vector.broadcast %cst_15 : f32 to vector<2x32xf32>
    %18 = arith.mulf %17, %16 : vector<2x32xf32>
    %19 = vector.extract_strided_slice %13 {offsets = [0, 32], sizes = [2, 32], strides = [1, 1]} : vector<2x128xf32> to vector<2x32xf32>
    %cst_16 = arith.constant 1.000000e+00 : f32
    %20 = vector.broadcast %cst_16 : f32 to vector<2x32xf32>
    %21 = arith.addf %20, %19 : vector<2x32xf32>
    %cst_17 = arith.constant 5.000000e-01 : f32
    %22 = vector.broadcast %cst_17 : f32 to vector<2x32xf32>
    %23 = arith.mulf %22, %21 : vector<2x32xf32>
    %24 = vector.extract_strided_slice %13 {offsets = [0, 64], sizes = [2, 32], strides = [1, 1]} : vector<2x128xf32> to vector<2x32xf32>
    %25 = vector.extract_strided_slice %13 {offsets = [0, 96], sizes = [2, 32], strides = [1, 1]} : vector<2x128xf32> to vector<2x32xf32>
    %cst_18 = arith.constant 1.000000e+00 : f32
    %26 = vector.broadcast %cst_18 : f32 to vector<2x32xf32>
    %27 = arith.addf %26, %25 : vector<2x32xf32>
    %cst_19 = arith.constant 5.000000e-01 : f32
    %28 = vector.broadcast %cst_19 : f32 to vector<2x32xf32>
    %29 = arith.mulf %28, %27 : vector<2x32xf32>
    %30 = arith.mulf %23, %8 : vector<2x32xf32>
    %31 = arith.mulf %18, %24 : vector<2x32xf32>
    %32 = arith.addf %30, %31 : vector<2x32xf32>
    %33 = math.tanh %32 : vector<2x32xf32>
    %34 = arith.mulf %29, %33 : vector<2x32xf32>
    %c0_20 = arith.constant 0 : index
    %c0_21 = arith.constant 0 : index
    %35 = vector.load %arg8[%c0_20, %c0_21] : memref<2x64xf32, #tpu.memory_space<vmem>>, vector<2x32xf32>
    tpu.vector_store %arg8[%c0_20, %c0_21], %34 {strides = array<i32>} : memref<2x64xf32, #tpu.memory_space<vmem>>, vector<2x32xf32>,
    %c0_22 = arith.constant 0 : index
    %c0_23 = arith.constant 0 : index
    %36 = vector.load %arg8[%c0_22, %c0_23] : memref<2x64xf32, #tpu.memory_space<vmem>>, vector<2x64xf32>
    %cst_24 = arith.constant dense<0.000000e+00> : vector<2x256xf32>
    %37 = tpu.matmul %36, %6, %cst_24 {dimension_numbers = #tpu.dot_dimension_numbers<[1], [0], [0], [1], [0, 0, 1, 1], [], []>} : vector<2x64xf32>, vector<64x256xf32>, vector<2x256xf32> -> vector<2x256xf32>
    %38 = vector.extract_strided_slice %37 {offsets = [0, 0], sizes = [2, 128], strides = [1, 1]} : vector<2x256xf32> to vector<2x128xf32>
    %39 = vector.broadcast %7 : vector<1x128xf32> to vector<2x128xf32>
    %40 = arith.addf %38, %39 : vector<2x128xf32>
    %41 = vector.extract_strided_slice %37 {offsets = [0, 128], sizes = [2, 128], strides = [1, 1]} : vector<2x256xf32> to vector<2x128xf32>
    %42 = math.tanh %40 : vector<2x128xf32>
    %43 = vector.extract_strided_slice %42 {offsets = [0, 0], sizes = [2, 32], strides = [1, 1]} : vector<2x128xf32> to vector<2x32xf32>
    %cst_25 = arith.constant 1.000000e+00 : f32
    %44 = vector.broadcast %cst_25 : f32 to vector<2x32xf32>
    %45 = arith.addf %44, %43 : vector<2x32xf32>
    %cst_26 = arith.constant 5.000000e-01 : f32
    %46 = vector.broadcast %cst_26 : f32 to vector<2x32xf32>
    %47 = arith.mulf %46, %45 : vector<2x32xf32>
    %48 = vector.extract_strided_slice %42 {offsets = [0, 32], sizes = [2, 32], strides = [1, 1]} : vector<2x128xf32> to vector<2x32xf32>
    %cst_27 = arith.constant 1.000000e+00 : f32
    %49 = vector.broadcast %cst_27 : f32 to vector<2x32xf32>
    %50 = arith.addf %49, %48 : vector<2x32xf32>
    %cst_28 = arith.constant 5.000000e-01 : f32
    %51 = vector.broadcast %cst_28 : f32 to vector<2x32xf32>
    %52 = arith.mulf %51, %50 : vector<2x32xf32>
    %53 = vector.extract_strided_slice %42 {offsets = [0, 64], sizes = [2, 32], strides = [1, 1]} : vector<2x128xf32> to vector<2x32xf32>
    %54 = vector.extract_strided_slice %42 {offsets = [0, 96], sizes = [2, 32], strides = [1, 1]} : vector<2x128xf32> to vector<2x32xf32>
    %cst_29 = arith.constant 1.000000e+00 : f32
    %55 = vector.broadcast %cst_29 : f32 to vector<2x32xf32>
    %56 = arith.addf %55, %54 : vector<2x32xf32>
    %cst_30 = arith.constant 5.000000e-01 : f32
    %57 = vector.broadcast %cst_30 : f32 to vector<2x32xf32>
    %58 = arith.mulf %57, %56 : vector<2x32xf32>
    %59 = arith.mulf %52, %9 : vector<2x32xf32>
    %60 = arith.mulf %47, %53 : vector<2x32xf32>
    %61 = arith.addf %59, %60 : vector<2x32xf32>
    %62 = math.tanh %61 : vector<2x32xf32>
    %63 = arith.mulf %58, %62 : vector<2x32xf32>
    %c0_31 = arith.constant 0 : index
    %c32 = arith.constant 32 : index
    %64 = vector.load %arg8[%c0_31, %c32] : memref<2x64xf32, #tpu.memory_space<vmem>>, vector<2x32xf32>
    tpu.vector_store %arg8[%c0_31, %c32], %63 {strides = array<i32>} : memref<2x64xf32, #tpu.memory_space<vmem>>, vector<2x32xf32>,
    %65 = vector.extract_strided_slice %5 {offsets = [2, 0], sizes = [2, 128], strides = [1, 1]} : vector<16x128xf32> to vector<2x128xf32>
    %66 = arith.addf %65, %41 : vector<2x128xf32>
    %67 = math.tanh %66 : vector<2x128xf32>
    %68 = vector.extract_strided_slice %67 {offsets = [0, 0], sizes = [2, 32], strides = [1, 1]} : vector<2x128xf32> to vector<2x32xf32>
    %cst_32 = arith.constant 1.000000e+00 : f32
    %69 = vector.broadcast %cst_32 : f32 to vector<2x32xf32>
    %70 = arith.addf %69, %68 : vector<2x32xf32>
    %cst_33 = arith.constant 5.000000e-01 : f32
    %71 = vector.broadcast %cst_33 : f32 to vector<2x32xf32>
    %72 = arith.mulf %71, %70 : vector<2x32xf32>
    %73 = vector.extract_strided_slice %67 {offsets = [0, 32], sizes = [2, 32], strides = [1, 1]} : vector<2x128xf32> to vector<2x32xf32>
    %cst_34 = arith.constant 1.000000e+00 : f32
    %74 = vector.broadcast %cst_34 : f32 to vector<2x32xf32>
    %75 = arith.addf %74, %73 : vector<2x32xf32>
    %cst_35 = arith.constant 5.000000e-01 : f32
    %76 = vector.broadcast %cst_35 : f32 to vector<2x32xf32>
    %77 = arith.mulf %76, %75 : vector<2x32xf32>
    %78 = vector.extract_strided_slice %67 {offsets = [0, 64], sizes = [2, 32], strides = [1, 1]} : vector<2x128xf32> to vector<2x32xf32>
    %79 = vector.extract_strided_slice %67 {offsets = [0, 96], sizes = [2, 32], strides = [1, 1]} : vector<2x128xf32> to vector<2x32xf32>
    %cst_36 = arith.constant 1.000000e+00 : f32
    %80 = vector.broadcast %cst_36 : f32 to vector<2x32xf32>
    %81 = arith.addf %80, %79 : vector<2x32xf32>
    %cst_37 = arith.constant 5.000000e-01 : f32
    %82 = vector.broadcast %cst_37 : f32 to vector<2x32xf32>
    %83 = arith.mulf %82, %81 : vector<2x32xf32>
    %84 = arith.mulf %77, %32 : vector<2x32xf32>
    %85 = arith.mulf %72, %78 : vector<2x32xf32>
    %86 = arith.addf %84, %85 : vector<2x32xf32>
    %87 = math.tanh %86 : vector<2x32xf32>
    %88 = arith.mulf %83, %87 : vector<2x32xf32>
    %c0_38 = arith.constant 0 : index
    %c0_39 = arith.constant 0 : index
    %89 = vector.load %arg8[%c0_38, %c0_39] : memref<2x64xf32, #tpu.memory_space<vmem>>, vector<2x32xf32>
    tpu.vector_store %arg8[%c0_38, %c0_39], %88 {strides = array<i32>} : memref<2x64xf32, #tpu.memory_space<vmem>>, vector<2x32xf32>,
    %c0_40 = arith.constant 0 : index
    %c0_41 = arith.constant 0 : index
    %90 = vector.load %arg8[%c0_40, %c0_41] : memref<2x64xf32, #tpu.memory_space<vmem>>, vector<2x64xf32>
    %cst_42 = arith.constant dense<0.000000e+00> : vector<2x256xf32>
    %91 = tpu.matmul %90, %6, %cst_42 {dimension_numbers = #tpu.dot_dimension_numbers<[1], [0], [0], [1], [0, 0, 1, 1], [], []>} : vector<2x64xf32>, vector<64x256xf32>, vector<2x256xf32> -> vector<2x256xf32>
    %92 = vector.extract_strided_slice %91 {offsets = [0, 0], sizes = [2, 128], strides = [1, 1]} : vector<2x256xf32> to vector<2x128xf32>
    %93 = vector.broadcast %7 : vector<1x128xf32> to vector<2x128xf32>
    %94 = arith.addf %92, %93 : vector<2x128xf32>
    %95 = vector.extract_strided_slice %91 {offsets = [0, 128], sizes = [2, 128], strides = [1, 1]} : vector<2x256xf32> to vector<2x128xf32>
    %96 = math.tanh %94 : vector<2x128xf32>
    %97 = vector.extract_strided_slice %96 {offsets = [0, 0], sizes = [2, 32], strides = [1, 1]} : vector<2x128xf32> to vector<2x32xf32>
    %cst_43 = arith.constant 1.000000e+00 : f32
    %98 = vector.broadcast %cst_43 : f32 to vector<2x32xf32>
    %99 = arith.addf %98, %97 : vector<2x32xf32>
    %cst_44 = arith.constant 5.000000e-01 : f32
    %100 = vector.broadcast %cst_44 : f32 to vector<2x32xf32>
    %101 = arith.mulf %100, %99 : vector<2x32xf32>
    %102 = vector.extract_strided_slice %96 {offsets = [0, 32], sizes = [2, 32], strides = [1, 1]} : vector<2x128xf32> to vector<2x32xf32>
    %cst_45 = arith.constant 1.000000e+00 : f32
    %103 = vector.broadcast %cst_45 : f32 to vector<2x32xf32>
    %104 = arith.addf %103, %102 : vector<2x32xf32>
    %cst_46 = arith.constant 5.000000e-01 : f32
    %105 = vector.broadcast %cst_46 : f32 to vector<2x32xf32>
    %106 = arith.mulf %105, %104 : vector<2x32xf32>
    %107 = vector.extract_strided_slice %96 {offsets = [0, 64], sizes = [2, 32], strides = [1, 1]} : vector<2x128xf32> to vector<2x32xf32>
    %108 = vector.extract_strided_slice %96 {offsets = [0, 96], sizes = [2, 32], strides = [1, 1]} : vector<2x128xf32> to vector<2x32xf32>
    %cst_47 = arith.constant 1.000000e+00 : f32
    %109 = vector.broadcast %cst_47 : f32 to vector<2x32xf32>
    %110 = arith.addf %109, %108 : vector<2x32xf32>
    %cst_48 = arith.constant 5.000000e-01 : f32
    %111 = vector.broadcast %cst_48 : f32 to vector<2x32xf32>
    %112 = arith.mulf %111, %110 : vector<2x32xf32>
    %113 = arith.mulf %106, %61 : vector<2x32xf32>
    %114 = arith.mulf %101, %107 : vector<2x32xf32>
    %115 = arith.addf %113, %114 : vector<2x32xf32>
    %116 = math.tanh %115 : vector<2x32xf32>
    %117 = arith.mulf %112, %116 : vector<2x32xf32>
    %c0_49 = arith.constant 0 : index
    %c32_50 = arith.constant 32 : index
    %118 = vector.load %arg8[%c0_49, %c32_50] : memref<2x64xf32, #tpu.memory_space<vmem>>, vector<2x32xf32>
    tpu.vector_store %arg8[%c0_49, %c32_50], %117 {strides = array<i32>} : memref<2x64xf32, #tpu.memory_space<vmem>>, vector<2x32xf32>,
    %119 = vector.extract_strided_slice %5 {offsets = [4, 0], sizes = [2, 128], strides = [1, 1]} : vector<16x128xf32> to vector<2x128xf32>
    %120 = arith.addf %119, %95 : vector<2x128xf32>
    %121 = math.tanh %120 : vector<2x128xf32>
    %122 = vector.extract_strided_slice %121 {offsets = [0, 0], sizes = [2, 32], strides = [1, 1]} : vector<2x128xf32> to vector<2x32xf32>
    %cst_51 = arith.constant 1.000000e+00 : f32
    %123 = vector.broadcast %cst_51 : f32 to vector<2x32xf32>
    %124 = arith.addf %123, %122 : vector<2x32xf32>
    %cst_52 = arith.constant 5.000000e-01 : f32
    %125 = vector.broadcast %cst_52 : f32 to vector<2x32xf32>
    %126 = arith.mulf %125, %124 : vector<2x32xf32>
    %127 = vector.extract_strided_slice %121 {offsets = [0, 32], sizes = [2, 32], strides = [1, 1]} : vector<2x128xf32> to vector<2x32xf32>
    %cst_53 = arith.constant 1.000000e+00 : f32
    %128 = vector.broadcast %cst_53 : f32 to vector<2x32xf32>
    %129 = arith.addf %128, %127 : vector<2x32xf32>
    %cst_54 = arith.constant 5.000000e-01 : f32
    %130 = vector.broadcast %cst_54 : f32 to vector<2x32xf32>
    %131 = arith.mulf %130, %129 : vector<2x32xf32>
    %132 = vector.extract_strided_slice %121 {offsets = [0, 64], sizes = [2, 32], strides = [1, 1]} : vector<2x128xf32> to vector<2x32xf32>
    %133 = vector.extract_strided_slice %121 {offsets = [0, 96], sizes = [2, 32], strides = [1, 1]} : vector<2x128xf32> to vector<2x32xf32>
    %cst_55 = arith.constant 1.000000e+00 : f32
    %134 = vector.broadcast %cst_55 : f32 to vector<2x32xf32>
    %135 = arith.addf %134, %133 : vector<2x32xf32>
    %cst_56 = arith.constant 5.000000e-01 : f32
    %136 = vector.broadcast %cst_56 : f32 to vector<2x32xf32>
    %137 = arith.mulf %136, %135 : vector<2x32xf32>
    %138 = arith.mulf %131, %86 : vector<2x32xf32>
    %139 = arith.mulf %126, %132 : vector<2x32xf32>
    %140 = arith.addf %138, %139 : vector<2x32xf32>
    %141 = math.tanh %140 : vector<2x32xf32>
    %142 = arith.mulf %137, %141 : vector<2x32xf32>
    %c0_57 = arith.constant 0 : index
    %c0_58 = arith.constant 0 : index
    %143 = vector.load %arg8[%c0_57, %c0_58] : memref<2x64xf32, #tpu.memory_space<vmem>>, vector<2x32xf32>
    tpu.vector_store %arg8[%c0_57, %c0_58], %142 {strides = array<i32>} : memref<2x64xf32, #tpu.memory_space<vmem>>, vector<2x32xf32>,
    %c0_59 = arith.constant 0 : index
    %c0_60 = arith.constant 0 : index
    %144 = vector.load %arg8[%c0_59, %c0_60] : memref<2x64xf32, #tpu.memory_space<vmem>>, vector<2x64xf32>
    %cst_61 = arith.constant dense<0.000000e+00> : vector<2x256xf32>
    %145 = tpu.matmul %144, %6, %cst_61 {dimension_numbers = #tpu.dot_dimension_numbers<[1], [0], [0], [1], [0, 0, 1, 1], [], []>} : vector<2x64xf32>, vector<64x256xf32>, vector<2x256xf32> -> vector<2x256xf32>
    %146 = vector.extract_strided_slice %145 {offsets = [0, 0], sizes = [2, 128], strides = [1, 1]} : vector<2x256xf32> to vector<2x128xf32>
    %147 = vector.broadcast %7 : vector<1x128xf32> to vector<2x128xf32>
    %148 = arith.addf %146, %147 : vector<2x128xf32>
    %149 = vector.extract_strided_slice %145 {offsets = [0, 128], sizes = [2, 128], strides = [1, 1]} : vector<2x256xf32> to vector<2x128xf32>
    %150 = math.tanh %148 : vector<2x128xf32>
    %151 = vector.extract_strided_slice %150 {offsets = [0, 0], sizes = [2, 32], strides = [1, 1]} : vector<2x128xf32> to vector<2x32xf32>
    %cst_62 = arith.constant 1.000000e+00 : f32
    %152 = vector.broadcast %cst_62 : f32 to vector<2x32xf32>
    %153 = arith.addf %152, %151 : vector<2x32xf32>
    %cst_63 = arith.constant 5.000000e-01 : f32
    %154 = vector.broadcast %cst_63 : f32 to vector<2x32xf32>
    %155 = arith.mulf %154, %153 : vector<2x32xf32>
    %156 = vector.extract_strided_slice %150 {offsets = [0, 32], sizes = [2, 32], strides = [1, 1]} : vector<2x128xf32> to vector<2x32xf32>
    %cst_64 = arith.constant 1.000000e+00 : f32
    %157 = vector.broadcast %cst_64 : f32 to vector<2x32xf32>
    %158 = arith.addf %157, %156 : vector<2x32xf32>
    %cst_65 = arith.constant 5.000000e-01 : f32
    %159 = vector.broadcast %cst_65 : f32 to vector<2x32xf32>
    %160 = arith.mulf %159, %158 : vector<2x32xf32>
    %161 = vector.extract_strided_slice %150 {offsets = [0, 64], sizes = [2, 32], strides = [1, 1]} : vector<2x128xf32> to vector<2x32xf32>
    %162 = vector.extract_strided_slice %150 {offsets = [0, 96], sizes = [2, 32], strides = [1, 1]} : vector<2x128xf32> to vector<2x32xf32>
    %cst_66 = arith.constant 1.000000e+00 : f32
    %163 = vector.broadcast %cst_66 : f32 to vector<2x32xf32>
    %164 = arith.addf %163, %162 : vector<2x32xf32>
    %cst_67 = arith.constant 5.000000e-01 : f32
    %165 = vector.broadcast %cst_67 : f32 to vector<2x32xf32>
    %166 = arith.mulf %165, %164 : vector<2x32xf32>
    %167 = arith.mulf %160, %115 : vector<2x32xf32>
    %168 = arith.mulf %155, %161 : vector<2x32xf32>
    %169 = arith.addf %167, %168 : vector<2x32xf32>
    %170 = math.tanh %169 : vector<2x32xf32>
    %171 = arith.mulf %166, %170 : vector<2x32xf32>
    %c0_68 = arith.constant 0 : index
    %c32_69 = arith.constant 32 : index
    %172 = vector.load %arg8[%c0_68, %c32_69] : memref<2x64xf32, #tpu.memory_space<vmem>>, vector<2x32xf32>
    tpu.vector_store %arg8[%c0_68, %c32_69], %171 {strides = array<i32>} : memref<2x64xf32, #tpu.memory_space<vmem>>, vector<2x32xf32>,
    %173 = vector.extract_strided_slice %5 {offsets = [6, 0], sizes = [2, 128], strides = [1, 1]} : vector<16x128xf32> to vector<2x128xf32>
    %174 = arith.addf %173, %149 : vector<2x128xf32>
    %175 = math.tanh %174 : vector<2x128xf32>
    %176 = vector.extract_strided_slice %175 {offsets = [0, 0], sizes = [2, 32], strides = [1, 1]} : vector<2x128xf32> to vector<2x32xf32>
    %cst_70 = arith.constant 1.000000e+00 : f32
    %177 = vector.broadcast %cst_70 : f32 to vector<2x32xf32>
    %178 = arith.addf %177, %176 : vector<2x32xf32>
    %cst_71 = arith.constant 5.000000e-01 : f32
    %179 = vector.broadcast %cst_71 : f32 to vector<2x32xf32>
    %180 = arith.mulf %179, %178 : vector<2x32xf32>
    %181 = vector.extract_strided_slice %175 {offsets = [0, 32], sizes = [2, 32], strides = [1, 1]} : vector<2x128xf32> to vector<2x32xf32>
    %cst_72 = arith.constant 1.000000e+00 : f32
    %182 = vector.broadcast %cst_72 : f32 to vector<2x32xf32>
    %183 = arith.addf %182, %181 : vector<2x32xf32>
    %cst_73 = arith.constant 5.000000e-01 : f32
    %184 = vector.broadcast %cst_73 : f32 to vector<2x32xf32>
    %185 = arith.mulf %184, %183 : vector<2x32xf32>
    %186 = vector.extract_strided_slice %175 {offsets = [0, 64], sizes = [2, 32], strides = [1, 1]} : vector<2x128xf32> to vector<2x32xf32>
    %187 = vector.extract_strided_slice %175 {offsets = [0, 96], sizes = [2, 32], strides = [1, 1]} : vector<2x128xf32> to vector<2x32xf32>
    %cst_74 = arith.constant 1.000000e+00 : f32
    %188 = vector.broadcast %cst_74 : f32 to vector<2x32xf32>
    %189 = arith.addf %188, %187 : vector<2x32xf32>
    %cst_75 = arith.constant 5.000000e-01 : f32
    %190 = vector.broadcast %cst_75 : f32 to vector<2x32xf32>
    %191 = arith.mulf %190, %189 : vector<2x32xf32>
    %192 = arith.mulf %185, %140 : vector<2x32xf32>
    %193 = arith.mulf %180, %186 : vector<2x32xf32>
    %194 = arith.addf %192, %193 : vector<2x32xf32>
    %195 = math.tanh %194 : vector<2x32xf32>
    %196 = arith.mulf %191, %195 : vector<2x32xf32>
    %c0_76 = arith.constant 0 : index
    %c0_77 = arith.constant 0 : index
    %197 = vector.load %arg8[%c0_76, %c0_77] : memref<2x64xf32, #tpu.memory_space<vmem>>, vector<2x32xf32>
    tpu.vector_store %arg8[%c0_76, %c0_77], %196 {strides = array<i32>} : memref<2x64xf32, #tpu.memory_space<vmem>>, vector<2x32xf32>,
    %c0_78 = arith.constant 0 : index
    %c0_79 = arith.constant 0 : index
    %198 = vector.load %arg8[%c0_78, %c0_79] : memref<2x64xf32, #tpu.memory_space<vmem>>, vector<2x64xf32>
    %cst_80 = arith.constant dense<0.000000e+00> : vector<2x256xf32>
    %199 = tpu.matmul %198, %6, %cst_80 {dimension_numbers = #tpu.dot_dimension_numbers<[1], [0], [0], [1], [0, 0, 1, 1], [], []>} : vector<2x64xf32>, vector<64x256xf32>, vector<2x256xf32> -> vector<2x256xf32>
    %200 = vector.extract_strided_slice %199 {offsets = [0, 0], sizes = [2, 128], strides = [1, 1]} : vector<2x256xf32> to vector<2x128xf32>
    %201 = vector.broadcast %7 : vector<1x128xf32> to vector<2x128xf32>
    %202 = arith.addf %200, %201 : vector<2x128xf32>
    %203 = vector.extract_strided_slice %199 {offsets = [0, 128], sizes = [2, 128], strides = [1, 1]} : vector<2x256xf32> to vector<2x128xf32>
    %204 = math.tanh %202 : vector<2x128xf32>
    %205 = vector.extract_strided_slice %204 {offsets = [0, 0], sizes = [2, 32], strides = [1, 1]} : vector<2x128xf32> to vector<2x32xf32>
    %cst_81 = arith.constant 1.000000e+00 : f32
    %206 = vector.broadcast %cst_81 : f32 to vector<2x32xf32>
    %207 = arith.addf %206, %205 : vector<2x32xf32>
    %cst_82 = arith.constant 5.000000e-01 : f32
    %208 = vector.broadcast %cst_82 : f32 to vector<2x32xf32>
    %209 = arith.mulf %208, %207 : vector<2x32xf32>
    %210 = vector.extract_strided_slice %204 {offsets = [0, 32], sizes = [2, 32], strides = [1, 1]} : vector<2x128xf32> to vector<2x32xf32>
    %cst_83 = arith.constant 1.000000e+00 : f32
    %211 = vector.broadcast %cst_83 : f32 to vector<2x32xf32>
    %212 = arith.addf %211, %210 : vector<2x32xf32>
    %cst_84 = arith.constant 5.000000e-01 : f32
    %213 = vector.broadcast %cst_84 : f32 to vector<2x32xf32>
    %214 = arith.mulf %213, %212 : vector<2x32xf32>
    %215 = vector.extract_strided_slice %204 {offsets = [0, 64], sizes = [2, 32], strides = [1, 1]} : vector<2x128xf32> to vector<2x32xf32>
    %216 = vector.extract_strided_slice %204 {offsets = [0, 96], sizes = [2, 32], strides = [1, 1]} : vector<2x128xf32> to vector<2x32xf32>
    %cst_85 = arith.constant 1.000000e+00 : f32
    %217 = vector.broadcast %cst_85 : f32 to vector<2x32xf32>
    %218 = arith.addf %217, %216 : vector<2x32xf32>
    %cst_86 = arith.constant 5.000000e-01 : f32
    %219 = vector.broadcast %cst_86 : f32 to vector<2x32xf32>
    %220 = arith.mulf %219, %218 : vector<2x32xf32>
    %221 = arith.mulf %214, %169 : vector<2x32xf32>
    %222 = arith.mulf %209, %215 : vector<2x32xf32>
    %223 = arith.addf %221, %222 : vector<2x32xf32>
    %224 = math.tanh %223 : vector<2x32xf32>
    %225 = arith.mulf %220, %224 : vector<2x32xf32>
    %c0_87 = arith.constant 0 : index
    %c32_88 = arith.constant 32 : index
    %226 = vector.load %arg8[%c0_87, %c32_88] : memref<2x64xf32, #tpu.memory_space<vmem>>, vector<2x32xf32>
    tpu.vector_store %arg8[%c0_87, %c32_88], %225 {strides = array<i32>} : memref<2x64xf32, #tpu.memory_space<vmem>>, vector<2x32xf32>,
    %227 = vector.extract_strided_slice %5 {offsets = [8, 0], sizes = [2, 128], strides = [1, 1]} : vector<16x128xf32> to vector<2x128xf32>
    %228 = arith.addf %227, %203 : vector<2x128xf32>
    %229 = math.tanh %228 : vector<2x128xf32>
    %230 = vector.extract_strided_slice %229 {offsets = [0, 0], sizes = [2, 32], strides = [1, 1]} : vector<2x128xf32> to vector<2x32xf32>
    %cst_89 = arith.constant 1.000000e+00 : f32
    %231 = vector.broadcast %cst_89 : f32 to vector<2x32xf32>
    %232 = arith.addf %231, %230 : vector<2x32xf32>
    %cst_90 = arith.constant 5.000000e-01 : f32
    %233 = vector.broadcast %cst_90 : f32 to vector<2x32xf32>
    %234 = arith.mulf %233, %232 : vector<2x32xf32>
    %235 = vector.extract_strided_slice %229 {offsets = [0, 32], sizes = [2, 32], strides = [1, 1]} : vector<2x128xf32> to vector<2x32xf32>
    %cst_91 = arith.constant 1.000000e+00 : f32
    %236 = vector.broadcast %cst_91 : f32 to vector<2x32xf32>
    %237 = arith.addf %236, %235 : vector<2x32xf32>
    %cst_92 = arith.constant 5.000000e-01 : f32
    %238 = vector.broadcast %cst_92 : f32 to vector<2x32xf32>
    %239 = arith.mulf %238, %237 : vector<2x32xf32>
    %240 = vector.extract_strided_slice %229 {offsets = [0, 64], sizes = [2, 32], strides = [1, 1]} : vector<2x128xf32> to vector<2x32xf32>
    %241 = vector.extract_strided_slice %229 {offsets = [0, 96], sizes = [2, 32], strides = [1, 1]} : vector<2x128xf32> to vector<2x32xf32>
    %cst_93 = arith.constant 1.000000e+00 : f32
    %242 = vector.broadcast %cst_93 : f32 to vector<2x32xf32>
    %243 = arith.addf %242, %241 : vector<2x32xf32>
    %cst_94 = arith.constant 5.000000e-01 : f32
    %244 = vector.broadcast %cst_94 : f32 to vector<2x32xf32>
    %245 = arith.mulf %244, %243 : vector<2x32xf32>
    %246 = arith.mulf %239, %194 : vector<2x32xf32>
    %247 = arith.mulf %234, %240 : vector<2x32xf32>
    %248 = arith.addf %246, %247 : vector<2x32xf32>
    %249 = math.tanh %248 : vector<2x32xf32>
    %250 = arith.mulf %245, %249 : vector<2x32xf32>
    %c0_95 = arith.constant 0 : index
    %c0_96 = arith.constant 0 : index
    %251 = vector.load %arg8[%c0_95, %c0_96] : memref<2x64xf32, #tpu.memory_space<vmem>>, vector<2x32xf32>
    tpu.vector_store %arg8[%c0_95, %c0_96], %250 {strides = array<i32>} : memref<2x64xf32, #tpu.memory_space<vmem>>, vector<2x32xf32>,
    %c0_97 = arith.constant 0 : index
    %c0_98 = arith.constant 0 : index
    %252 = vector.load %arg8[%c0_97, %c0_98] : memref<2x64xf32, #tpu.memory_space<vmem>>, vector<2x64xf32>
    %cst_99 = arith.constant dense<0.000000e+00> : vector<2x256xf32>
    %253 = tpu.matmul %252, %6, %cst_99 {dimension_numbers = #tpu.dot_dimension_numbers<[1], [0], [0], [1], [0, 0, 1, 1], [], []>} : vector<2x64xf32>, vector<64x256xf32>, vector<2x256xf32> -> vector<2x256xf32>
    %254 = vector.extract_strided_slice %253 {offsets = [0, 0], sizes = [2, 128], strides = [1, 1]} : vector<2x256xf32> to vector<2x128xf32>
    %255 = vector.broadcast %7 : vector<1x128xf32> to vector<2x128xf32>
    %256 = arith.addf %254, %255 : vector<2x128xf32>
    %257 = vector.extract_strided_slice %253 {offsets = [0, 128], sizes = [2, 128], strides = [1, 1]} : vector<2x256xf32> to vector<2x128xf32>
    %258 = math.tanh %256 : vector<2x128xf32>
    %259 = vector.extract_strided_slice %258 {offsets = [0, 0], sizes = [2, 32], strides = [1, 1]} : vector<2x128xf32> to vector<2x32xf32>
    %cst_100 = arith.constant 1.000000e+00 : f32
    %260 = vector.broadcast %cst_100 : f32 to vector<2x32xf32>
    %261 = arith.addf %260, %259 : vector<2x32xf32>
    %cst_101 = arith.constant 5.000000e-01 : f32
    %262 = vector.broadcast %cst_101 : f32 to vector<2x32xf32>
    %263 = arith.mulf %262, %261 : vector<2x32xf32>
    %264 = vector.extract_strided_slice %258 {offsets = [0, 32], sizes = [2, 32], strides = [1, 1]} : vector<2x128xf32> to vector<2x32xf32>
    %cst_102 = arith.constant 1.000000e+00 : f32
    %265 = vector.broadcast %cst_102 : f32 to vector<2x32xf32>
    %266 = arith.addf %265, %264 : vector<2x32xf32>
    %cst_103 = arith.constant 5.000000e-01 : f32
    %267 = vector.broadcast %cst_103 : f32 to vector<2x32xf32>
    %268 = arith.mulf %267, %266 : vector<2x32xf32>
    %269 = vector.extract_strided_slice %258 {offsets = [0, 64], sizes = [2, 32], strides = [1, 1]} : vector<2x128xf32> to vector<2x32xf32>
    %270 = vector.extract_strided_slice %258 {offsets = [0, 96], sizes = [2, 32], strides = [1, 1]} : vector<2x128xf32> to vector<2x32xf32>
    %cst_104 = arith.constant 1.000000e+00 : f32
    %271 = vector.broadcast %cst_104 : f32 to vector<2x32xf32>
    %272 = arith.addf %271, %270 : vector<2x32xf32>
    %cst_105 = arith.constant 5.000000e-01 : f32
    %273 = vector.broadcast %cst_105 : f32 to vector<2x32xf32>
    %274 = arith.mulf %273, %272 : vector<2x32xf32>
    %275 = arith.mulf %268, %223 : vector<2x32xf32>
    %276 = arith.mulf %263, %269 : vector<2x32xf32>
    %277 = arith.addf %275, %276 : vector<2x32xf32>
    %278 = math.tanh %277 : vector<2x32xf32>
    %279 = arith.mulf %274, %278 : vector<2x32xf32>
    %c0_106 = arith.constant 0 : index
    %c32_107 = arith.constant 32 : index
    %280 = vector.load %arg8[%c0_106, %c32_107] : memref<2x64xf32, #tpu.memory_space<vmem>>, vector<2x32xf32>
    tpu.vector_store %arg8[%c0_106, %c32_107], %279 {strides = array<i32>} : memref<2x64xf32, #tpu.memory_space<vmem>>, vector<2x32xf32>,
    %281 = vector.extract_strided_slice %5 {offsets = [10, 0], sizes = [2, 128], strides = [1, 1]} : vector<16x128xf32> to vector<2x128xf32>
    %282 = arith.addf %281, %257 : vector<2x128xf32>
    %283 = math.tanh %282 : vector<2x128xf32>
    %284 = vector.extract_strided_slice %283 {offsets = [0, 0], sizes = [2, 32], strides = [1, 1]} : vector<2x128xf32> to vector<2x32xf32>
    %cst_108 = arith.constant 1.000000e+00 : f32
    %285 = vector.broadcast %cst_108 : f32 to vector<2x32xf32>
    %286 = arith.addf %285, %284 : vector<2x32xf32>
    %cst_109 = arith.constant 5.000000e-01 : f32
    %287 = vector.broadcast %cst_109 : f32 to vector<2x32xf32>
    %288 = arith.mulf %287, %286 : vector<2x32xf32>
    %289 = vector.extract_strided_slice %283 {offsets = [0, 32], sizes = [2, 32], strides = [1, 1]} : vector<2x128xf32> to vector<2x32xf32>
    %cst_110 = arith.constant 1.000000e+00 : f32
    %290 = vector.broadcast %cst_110 : f32 to vector<2x32xf32>
    %291 = arith.addf %290, %289 : vector<2x32xf32>
    %cst_111 = arith.constant 5.000000e-01 : f32
    %292 = vector.broadcast %cst_111 : f32 to vector<2x32xf32>
    %293 = arith.mulf %292, %291 : vector<2x32xf32>
    %294 = vector.extract_strided_slice %283 {offsets = [0, 64], sizes = [2, 32], strides = [1, 1]} : vector<2x128xf32> to vector<2x32xf32>
    %295 = vector.extract_strided_slice %283 {offsets = [0, 96], sizes = [2, 32], strides = [1, 1]} : vector<2x128xf32> to vector<2x32xf32>
    %cst_112 = arith.constant 1.000000e+00 : f32
    %296 = vector.broadcast %cst_112 : f32 to vector<2x32xf32>
    %297 = arith.addf %296, %295 : vector<2x32xf32>
    %cst_113 = arith.constant 5.000000e-01 : f32
    %298 = vector.broadcast %cst_113 : f32 to vector<2x32xf32>
    %299 = arith.mulf %298, %297 : vector<2x32xf32>
    %300 = arith.mulf %293, %248 : vector<2x32xf32>
    %301 = arith.mulf %288, %294 : vector<2x32xf32>
    %302 = arith.addf %300, %301 : vector<2x32xf32>
    %303 = math.tanh %302 : vector<2x32xf32>
    %304 = arith.mulf %299, %303 : vector<2x32xf32>
    %c0_114 = arith.constant 0 : index
    %c0_115 = arith.constant 0 : index
    %305 = vector.load %arg8[%c0_114, %c0_115] : memref<2x64xf32, #tpu.memory_space<vmem>>, vector<2x32xf32>
    tpu.vector_store %arg8[%c0_114, %c0_115], %304 {strides = array<i32>} : memref<2x64xf32, #tpu.memory_space<vmem>>, vector<2x32xf32>,
    %c0_116 = arith.constant 0 : index
    %c0_117 = arith.constant 0 : index
    %306 = vector.load %arg8[%c0_116, %c0_117] : memref<2x64xf32, #tpu.memory_space<vmem>>, vector<2x64xf32>
    %cst_118 = arith.constant dense<0.000000e+00> : vector<2x256xf32>
    %307 = tpu.matmul %306, %6, %cst_118 {dimension_numbers = #tpu.dot_dimension_numbers<[1], [0], [0], [1], [0, 0, 1, 1], [], []>} : vector<2x64xf32>, vector<64x256xf32>, vector<2x256xf32> -> vector<2x256xf32>
    %308 = vector.extract_strided_slice %307 {offsets = [0, 0], sizes = [2, 128], strides = [1, 1]} : vector<2x256xf32> to vector<2x128xf32>
    %309 = vector.broadcast %7 : vector<1x128xf32> to vector<2x128xf32>
    %310 = arith.addf %308, %309 : vector<2x128xf32>
    %311 = vector.extract_strided_slice %307 {offsets = [0, 128], sizes = [2, 128], strides = [1, 1]} : vector<2x256xf32> to vector<2x128xf32>
    %312 = math.tanh %310 : vector<2x128xf32>
    %313 = vector.extract_strided_slice %312 {offsets = [0, 0], sizes = [2, 32], strides = [1, 1]} : vector<2x128xf32> to vector<2x32xf32>
    %cst_119 = arith.constant 1.000000e+00 : f32
    %314 = vector.broadcast %cst_119 : f32 to vector<2x32xf32>
    %315 = arith.addf %314, %313 : vector<2x32xf32>
    %cst_120 = arith.constant 5.000000e-01 : f32
    %316 = vector.broadcast %cst_120 : f32 to vector<2x32xf32>
    %317 = arith.mulf %316, %315 : vector<2x32xf32>
    %318 = vector.extract_strided_slice %312 {offsets = [0, 32], sizes = [2, 32], strides = [1, 1]} : vector<2x128xf32> to vector<2x32xf32>
    %cst_121 = arith.constant 1.000000e+00 : f32
    %319 = vector.broadcast %cst_121 : f32 to vector<2x32xf32>
    %320 = arith.addf %319, %318 : vector<2x32xf32>
    %cst_122 = arith.constant 5.000000e-01 : f32
    %321 = vector.broadcast %cst_122 : f32 to vector<2x32xf32>
    %322 = arith.mulf %321, %320 : vector<2x32xf32>
    %323 = vector.extract_strided_slice %312 {offsets = [0, 64], sizes = [2, 32], strides = [1, 1]} : vector<2x128xf32> to vector<2x32xf32>
    %324 = vector.extract_strided_slice %312 {offsets = [0, 96], sizes = [2, 32], strides = [1, 1]} : vector<2x128xf32> to vector<2x32xf32>
    %cst_123 = arith.constant 1.000000e+00 : f32
    %325 = vector.broadcast %cst_123 : f32 to vector<2x32xf32>
    %326 = arith.addf %325, %324 : vector<2x32xf32>
    %cst_124 = arith.constant 5.000000e-01 : f32
    %327 = vector.broadcast %cst_124 : f32 to vector<2x32xf32>
    %328 = arith.mulf %327, %326 : vector<2x32xf32>
    %329 = arith.mulf %322, %277 : vector<2x32xf32>
    %330 = arith.mulf %317, %323 : vector<2x32xf32>
    %331 = arith.addf %329, %330 : vector<2x32xf32>
    %332 = math.tanh %331 : vector<2x32xf32>
    %333 = arith.mulf %328, %332 : vector<2x32xf32>
    %c0_125 = arith.constant 0 : index
    %c32_126 = arith.constant 32 : index
    %334 = vector.load %arg8[%c0_125, %c32_126] : memref<2x64xf32, #tpu.memory_space<vmem>>, vector<2x32xf32>
    tpu.vector_store %arg8[%c0_125, %c32_126], %333 {strides = array<i32>} : memref<2x64xf32, #tpu.memory_space<vmem>>, vector<2x32xf32>,
    %335 = vector.extract_strided_slice %5 {offsets = [12, 0], sizes = [2, 128], strides = [1, 1]} : vector<16x128xf32> to vector<2x128xf32>
    %336 = arith.addf %335, %311 : vector<2x128xf32>
    %337 = math.tanh %336 : vector<2x128xf32>
    %338 = vector.extract_strided_slice %337 {offsets = [0, 0], sizes = [2, 32], strides = [1, 1]} : vector<2x128xf32> to vector<2x32xf32>
    %cst_127 = arith.constant 1.000000e+00 : f32
    %339 = vector.broadcast %cst_127 : f32 to vector<2x32xf32>
    %340 = arith.addf %339, %338 : vector<2x32xf32>
    %cst_128 = arith.constant 5.000000e-01 : f32
    %341 = vector.broadcast %cst_128 : f32 to vector<2x32xf32>
    %342 = arith.mulf %341, %340 : vector<2x32xf32>
    %343 = vector.extract_strided_slice %337 {offsets = [0, 32], sizes = [2, 32], strides = [1, 1]} : vector<2x128xf32> to vector<2x32xf32>
    %cst_129 = arith.constant 1.000000e+00 : f32
    %344 = vector.broadcast %cst_129 : f32 to vector<2x32xf32>
    %345 = arith.addf %344, %343 : vector<2x32xf32>
    %cst_130 = arith.constant 5.000000e-01 : f32
    %346 = vector.broadcast %cst_130 : f32 to vector<2x32xf32>
    %347 = arith.mulf %346, %345 : vector<2x32xf32>
    %348 = vector.extract_strided_slice %337 {offsets = [0, 64], sizes = [2, 32], strides = [1, 1]} : vector<2x128xf32> to vector<2x32xf32>
    %349 = vector.extract_strided_slice %337 {offsets = [0, 96], sizes = [2, 32], strides = [1, 1]} : vector<2x128xf32> to vector<2x32xf32>
    %cst_131 = arith.constant 1.000000e+00 : f32
    %350 = vector.broadcast %cst_131 : f32 to vector<2x32xf32>
    %351 = arith.addf %350, %349 : vector<2x32xf32>
    %cst_132 = arith.constant 5.000000e-01 : f32
    %352 = vector.broadcast %cst_132 : f32 to vector<2x32xf32>
    %353 = arith.mulf %352, %351 : vector<2x32xf32>
    %354 = arith.mulf %347, %302 : vector<2x32xf32>
    %355 = arith.mulf %342, %348 : vector<2x32xf32>
    %356 = arith.addf %354, %355 : vector<2x32xf32>
    %357 = math.tanh %356 : vector<2x32xf32>
    %358 = arith.mulf %353, %357 : vector<2x32xf32>
    %c0_133 = arith.constant 0 : index
    %c0_134 = arith.constant 0 : index
    %359 = vector.load %arg8[%c0_133, %c0_134] : memref<2x64xf32, #tpu.memory_space<vmem>>, vector<2x32xf32>
    tpu.vector_store %arg8[%c0_133, %c0_134], %358 {strides = array<i32>} : memref<2x64xf32, #tpu.memory_space<vmem>>, vector<2x32xf32>,
    %c0_135 = arith.constant 0 : index
    %c0_136 = arith.constant 0 : index
    %360 = vector.load %arg8[%c0_135, %c0_136] : memref<2x64xf32, #tpu.memory_space<vmem>>, vector<2x64xf32>
    %cst_137 = arith.constant dense<0.000000e+00> : vector<2x256xf32>
    %361 = tpu.matmul %360, %6, %cst_137 {dimension_numbers = #tpu.dot_dimension_numbers<[1], [0], [0], [1], [0, 0, 1, 1], [], []>} : vector<2x64xf32>, vector<64x256xf32>, vector<2x256xf32> -> vector<2x256xf32>
    %362 = vector.extract_strided_slice %361 {offsets = [0, 0], sizes = [2, 128], strides = [1, 1]} : vector<2x256xf32> to vector<2x128xf32>
    %363 = vector.broadcast %7 : vector<1x128xf32> to vector<2x128xf32>
    %364 = arith.addf %362, %363 : vector<2x128xf32>
    %365 = vector.extract_strided_slice %361 {offsets = [0, 128], sizes = [2, 128], strides = [1, 1]} : vector<2x256xf32> to vector<2x128xf32>
    %366 = math.tanh %364 : vector<2x128xf32>
    %367 = vector.extract_strided_slice %366 {offsets = [0, 0], sizes = [2, 32], strides = [1, 1]} : vector<2x128xf32> to vector<2x32xf32>
    %cst_138 = arith.constant 1.000000e+00 : f32
    %368 = vector.broadcast %cst_138 : f32 to vector<2x32xf32>
    %369 = arith.addf %368, %367 : vector<2x32xf32>
    %cst_139 = arith.constant 5.000000e-01 : f32
    %370 = vector.broadcast %cst_139 : f32 to vector<2x32xf32>
    %371 = arith.mulf %370, %369 : vector<2x32xf32>
    %372 = vector.extract_strided_slice %366 {offsets = [0, 32], sizes = [2, 32], strides = [1, 1]} : vector<2x128xf32> to vector<2x32xf32>
    %cst_140 = arith.constant 1.000000e+00 : f32
    %373 = vector.broadcast %cst_140 : f32 to vector<2x32xf32>
    %374 = arith.addf %373, %372 : vector<2x32xf32>
    %cst_141 = arith.constant 5.000000e-01 : f32
    %375 = vector.broadcast %cst_141 : f32 to vector<2x32xf32>
    %376 = arith.mulf %375, %374 : vector<2x32xf32>
    %377 = vector.extract_strided_slice %366 {offsets = [0, 64], sizes = [2, 32], strides = [1, 1]} : vector<2x128xf32> to vector<2x32xf32>
    %378 = vector.extract_strided_slice %366 {offsets = [0, 96], sizes = [2, 32], strides = [1, 1]} : vector<2x128xf32> to vector<2x32xf32>
    %cst_142 = arith.constant 1.000000e+00 : f32
    %379 = vector.broadcast %cst_142 : f32 to vector<2x32xf32>
    %380 = arith.addf %379, %378 : vector<2x32xf32>
    %cst_143 = arith.constant 5.000000e-01 : f32
    %381 = vector.broadcast %cst_143 : f32 to vector<2x32xf32>
    %382 = arith.mulf %381, %380 : vector<2x32xf32>
    %383 = arith.mulf %376, %331 : vector<2x32xf32>
    %384 = arith.mulf %371, %377 : vector<2x32xf32>
    %385 = arith.addf %383, %384 : vector<2x32xf32>
    %386 = math.tanh %385 : vector<2x32xf32>
    %387 = arith.mulf %382, %386 : vector<2x32xf32>
    %c0_144 = arith.constant 0 : index
    %c32_145 = arith.constant 32 : index
    %388 = vector.load %arg8[%c0_144, %c32_145] : memref<2x64xf32, #tpu.memory_space<vmem>>, vector<2x32xf32>
    tpu.vector_store %arg8[%c0_144, %c32_145], %387 {strides = array<i32>} : memref<2x64xf32, #tpu.memory_space<vmem>>, vector<2x32xf32>,
    %389 = vector.extract_strided_slice %5 {offsets = [14, 0], sizes = [2, 128], strides = [1, 1]} : vector<16x128xf32> to vector<2x128xf32>
    %390 = arith.addf %389, %365 : vector<2x128xf32>
    %391 = math.tanh %390 : vector<2x128xf32>
    %392 = vector.extract_strided_slice %391 {offsets = [0, 0], sizes = [2, 32], strides = [1, 1]} : vector<2x128xf32> to vector<2x32xf32>
    %cst_146 = arith.constant 1.000000e+00 : f32
    %393 = vector.broadcast %cst_146 : f32 to vector<2x32xf32>
    %394 = arith.addf %393, %392 : vector<2x32xf32>
    %cst_147 = arith.constant 5.000000e-01 : f32
    %395 = vector.broadcast %cst_147 : f32 to vector<2x32xf32>
    %396 = arith.mulf %395, %394 : vector<2x32xf32>
    %397 = vector.extract_strided_slice %391 {offsets = [0, 32], sizes = [2, 32], strides = [1, 1]} : vector<2x128xf32> to vector<2x32xf32>
    %cst_148 = arith.constant 1.000000e+00 : f32
    %398 = vector.broadcast %cst_148 : f32 to vector<2x32xf32>
    %399 = arith.addf %398, %397 : vector<2x32xf32>
    %cst_149 = arith.constant 5.000000e-01 : f32
    %400 = vector.broadcast %cst_149 : f32 to vector<2x32xf32>
    %401 = arith.mulf %400, %399 : vector<2x32xf32>
    %402 = vector.extract_strided_slice %391 {offsets = [0, 64], sizes = [2, 32], strides = [1, 1]} : vector<2x128xf32> to vector<2x32xf32>
    %403 = vector.extract_strided_slice %391 {offsets = [0, 96], sizes = [2, 32], strides = [1, 1]} : vector<2x128xf32> to vector<2x32xf32>
    %cst_150 = arith.constant 1.000000e+00 : f32
    %404 = vector.broadcast %cst_150 : f32 to vector<2x32xf32>
    %405 = arith.addf %404, %403 : vector<2x32xf32>
    %cst_151 = arith.constant 5.000000e-01 : f32
    %406 = vector.broadcast %cst_151 : f32 to vector<2x32xf32>
    %407 = arith.mulf %406, %405 : vector<2x32xf32>
    %408 = arith.mulf %401, %356 : vector<2x32xf32>
    %409 = arith.mulf %396, %402 : vector<2x32xf32>
    %410 = arith.addf %408, %409 : vector<2x32xf32>
    %411 = math.tanh %410 : vector<2x32xf32>
    %412 = arith.mulf %407, %411 : vector<2x32xf32>
    %c0_152 = arith.constant 0 : index
    %c0_153 = arith.constant 0 : index
    %413 = vector.load %arg8[%c0_152, %c0_153] : memref<2x64xf32, #tpu.memory_space<vmem>>, vector<2x32xf32>
    tpu.vector_store %arg8[%c0_152, %c0_153], %412 {strides = array<i32>} : memref<2x64xf32, #tpu.memory_space<vmem>>, vector<2x32xf32>,
    %c0_154 = arith.constant 0 : index
    %c0_155 = arith.constant 0 : index
    %414 = vector.load %arg8[%c0_154, %c0_155] : memref<2x64xf32, #tpu.memory_space<vmem>>, vector<2x64xf32>
    %cst_156 = arith.constant dense<0.000000e+00> : vector<2x256xf32>
    %415 = tpu.matmul %414, %6, %cst_156 {dimension_numbers = #tpu.dot_dimension_numbers<[1], [0], [0], [1], [0, 0, 1, 1], [], []>} : vector<2x64xf32>, vector<64x256xf32>, vector<2x256xf32> -> vector<2x256xf32>
    %416 = vector.extract_strided_slice %415 {offsets = [0, 0], sizes = [2, 128], strides = [1, 1]} : vector<2x256xf32> to vector<2x128xf32>
    %417 = vector.broadcast %7 : vector<1x128xf32> to vector<2x128xf32>
    %418 = arith.addf %416, %417 : vector<2x128xf32>
    %419 = math.tanh %418 : vector<2x128xf32>
    %420 = vector.extract_strided_slice %419 {offsets = [0, 0], sizes = [2, 32], strides = [1, 1]} : vector<2x128xf32> to vector<2x32xf32>
    %cst_157 = arith.constant 1.000000e+00 : f32
    %421 = vector.broadcast %cst_157 : f32 to vector<2x32xf32>
    %422 = arith.addf %421, %420 : vector<2x32xf32>
    %cst_158 = arith.constant 5.000000e-01 : f32
    %423 = vector.broadcast %cst_158 : f32 to vector<2x32xf32>
    %424 = arith.mulf %423, %422 : vector<2x32xf32>
    %425 = vector.extract_strided_slice %419 {offsets = [0, 32], sizes = [2, 32], strides = [1, 1]} : vector<2x128xf32> to vector<2x32xf32>
    %cst_159 = arith.constant 1.000000e+00 : f32
    %426 = vector.broadcast %cst_159 : f32 to vector<2x32xf32>
    %427 = arith.addf %426, %425 : vector<2x32xf32>
    %cst_160 = arith.constant 5.000000e-01 : f32
    %428 = vector.broadcast %cst_160 : f32 to vector<2x32xf32>
    %429 = arith.mulf %428, %427 : vector<2x32xf32>
    %430 = vector.extract_strided_slice %419 {offsets = [0, 64], sizes = [2, 32], strides = [1, 1]} : vector<2x128xf32> to vector<2x32xf32>
    %431 = vector.extract_strided_slice %419 {offsets = [0, 96], sizes = [2, 32], strides = [1, 1]} : vector<2x128xf32> to vector<2x32xf32>
    %cst_161 = arith.constant 1.000000e+00 : f32
    %432 = vector.broadcast %cst_161 : f32 to vector<2x32xf32>
    %433 = arith.addf %432, %431 : vector<2x32xf32>
    %cst_162 = arith.constant 5.000000e-01 : f32
    %434 = vector.broadcast %cst_162 : f32 to vector<2x32xf32>
    %435 = arith.mulf %434, %433 : vector<2x32xf32>
    %436 = arith.mulf %429, %385 : vector<2x32xf32>
    %437 = arith.mulf %424, %430 : vector<2x32xf32>
    %438 = arith.addf %436, %437 : vector<2x32xf32>
    %439 = math.tanh %438 : vector<2x32xf32>
    %440 = arith.mulf %435, %439 : vector<2x32xf32>
    %c0_163 = arith.constant 0 : index
    %c0_164 = arith.constant 0 : index
    %441 = vector.load %arg5[%c0_163, %c0_164] : memref<32x128xf32, #tpu.memory_space<vmem>>, vector<32x128xf32>
    %cst_165 = arith.constant dense<0.000000e+00> : vector<2x128xf32>
    %442 = tpu.matmul %440, %441, %cst_165 {dimension_numbers = #tpu.dot_dimension_numbers<[1], [0], [0], [1], [0, 0, 1, 1], [], []>} : vector<2x32xf32>, vector<32x128xf32>, vector<2x128xf32> -> vector<2x128xf32>
    %c0_166 = arith.constant 0 : index
    %c0_167 = arith.constant 0 : index
    %443 = vector.load %arg6[%c0_166, %c0_167] : memref<1x128xf32, #tpu.memory_space<vmem>>, vector<1x128xf32>
    %444 = vector.broadcast %443 : vector<1x128xf32> to vector<2x128xf32>
    %445 = arith.addf %442, %444 : vector<2x128xf32>
    %c0_168 = arith.constant 0 : index
    %c0_169 = arith.constant 0 : index
    %446 = vector.load %arg7[%c0_168, %c0_169] : memref<2x128xf32, #tpu.memory_space<vmem>>, vector<2x128xf32>
    tpu.vector_store %arg7[%c0_168, %c0_169], %445 {strides = array<i32>} : memref<2x128xf32, #tpu.memory_space<vmem>>, vector<2x128xf32>,
    return
  }
}

</mosaic_0001>

<bundles_post_ra>
// kernel: lstm_model_forward.1
= control target key start
LH: loop header
LB: loop body
LE: loop exit
PB: predicated region body
PF: predicated region fallthrough
CT: control target
= control target key end

     0   :  { %12 = vsyncpa [#allocation4], 0  ;;  %s1914_s0 = inlined_call_operand.vmem [shape: f32[16,8], index: 0, kind: input, shape index: {}]   ;;  %s1915_s1 = inlined_call_operand.vmem [shape: f32[8,128], index: 1, kind: input, shape index: {}]   ;;  %s1916_s2 = inlined_call_operand.vmem [shape: f32[1,128], index: 2, kind: input, shape index: {}]   ;;  %s1917_s3 = inlined_call_operand.hbm [shape: f32[64,256], index: 3, kind: input, shape index: {}]   ;;  %s1918_s4 = inlined_call_operand.vmem [shape: f32[1,128], index: 4, kind: input, shape index: {}]   ;;  %s1919_s5 = inlined_call_operand.vmem [shape: f32[32,128], index: 5, kind: input, shape index: {}]   ;;  %s1920_s6 = inlined_call_operand.vmem [shape: f32[1,128], index: 6, kind: input, shape index: {}]   ;;  %s1921_s7 = inlined_call_operand.hbm [shape: f32[2,128], index: 7, kind: output, shape index: {}]  }
   0x1   :  { %13 = vsyncpa [#allocation5], 0  ;;  %s1608_s24 = smov [#allocation3]   ;;  %s1560_s28 = scalar_lea.hbm %s1917_s3, 2048 }
   0x2   :  { %s25_s25 = sshll.u32 %s1608_s24, 4  ;;  %p1561_p0 = scmp.ne.s32.totalorder %s1917_s3, %s1560_s28  ;;  %s26_s25 = int_to_ptr.vmem [resolvable:$true] %s25_s25 }
   0x3   :  { %p1564_p1 = scmp.lt.u32.totalorder %s1560_s28, %s1917_s3 }
   0x5   :  { %p1566_p2 = pnand %p1564_p1, %p1561_p0 }
   0x7   :  { %1569 = shalt.err (!%p1566_p2)
}
   0x8   :  { %s1570_s10 = scalar_lea.vmem %s26_s25, 2048  ;;  %p1575_p4 = scmp.lt.s32.totalorder %s26_s25, %s26_s25 }
   0x9   :  { %p1571_p3 = scmp.ne.s32.totalorder %s26_s25, %s1570_s10  ;;  %p1576_p5 = scmp.lt.s32.totalorder %s1570_s10, %s1570_s10 }
   0xb   :  { %p1577_p6 = por %p1576_p5, %p1575_p4 }
   0xd   :  { %p1578_p7 = pnand %p1577_p6, %p1571_p3 }
   0xf   :  { %1581 = shalt.err (!%p1578_p7)
}
  0x10   :  { %s1609_s11 = smov 256   ;;  %s1610_s12 = smov 16  }
  0x11   :  { %31 = dma.hbm_to_vmem [thread:$0]  %s1917_s3, 2048, %s26_s25, [#allocation4], %s1609_s11, %s1609_s11, %s1610_s12  }
  0x12   :  { %1604 = dma.done.wait [#allocation4], 2048  }
  0x13   :  { %1605 = vsyncadd [#allocation4], 4294965248  ;;  %vm51_vm0 = vcmask 64512   ;;  %v43_v0 = vld [vmem:[%s1915_s1] sm:$0xff]  ;;  %v42_v2 = vld [vmem:[%s1914_s0 + $0x8] sm:$0xff]  ;;  %s1611_s1 = smov 64  }
  0x14   :  { %v41_v1 = vld [vmem:[%s1914_s0] sm:$0xff]  ;;  %1337 = vmatprep.subr.mxu0 %v43_v0  ;;  %s1612_s0 = smov 32   ;;  %v134_v16 = vld [vmem:[#allocation3 + $0x8] sm:$0xff]  ;;  %vm150_vm1 = vcmask 517120   ;;  %v135_v20 = vld [vmem:[#allocation3 + $0x10] sm:$0xff]  ;;  %v1613_v23 = vmov 0.0  }
  0x15   :  { %1339 = vmatprep.mubr.msk.f32.mxu0 %vm51_vm0, %v41_v1  ;;  %1338 = vmatpush3.msra.mxu0 %v43_v0  ;;  %v1315_v3 = vld [vmem:[%s1916_s2] ss:$0 sm:$0xff]  ;;  %v133_v18 = vld [vmem:[#allocation3] sm:$0xff]  ;;  %v138_v21 = vld [vmem:[#allocation3 + $0x28] sm:$0xff]  ;;  %151 = vst.msk [vmem:[#allocation2] sm:$0x3] %vm150_vm1, %v1613_v23 }
  0x16   :  { %1340 = vmatmul.mubr.msk.f32.vlgmr.msra.gmra.mrb[0].mxu0 %vm51_vm0, %v42_v2  ;;  %v136_v17 = vld [vmem:[#allocation3 + $0x18] sm:$0xff]  ;;  %247 = vmatprep.mubr.f32.mxu1 %v1613_v23  ;;  %v1696_v24 = vpack.c.bf16 %v135_v20, %v133_v18  ;;  %v137_v26 = vld [vmem:[#allocation3 + $0x20] sm:$0xff]  ;;  %v139_v27 = vld [vmem:[#allocation3 + $0x30] sm:$0xff]  ;;  %vm176_vm2 = vcmask 254976   ;;  %vm179_vm3 = vcmask 523264   ;;  %vm285_vm4 = vcmask 517376  }
  0x17   :  { %v1691_v19 = vpack.c.bf16 %v136_v17, %v134_v16  ;;  %v140_v22 = vld [vmem:[#allocation3 + $0x38] sm:$0xff]  ;;  %388 = vmatprep.mubr.f32.mxu0 %v1613_v23  ;;  %v1703_v28 = vpack.c.bf16 %v139_v27, %v137_v26  ;;  %v142_v30 = vld [vmem:[#allocation3 + $0x48] sm:$0xff]  ;;  %v141_v33 = vld [vmem:[#allocation3 + $0x40] sm:$0xff]  ;;  %vm318_vm5 = vcmask 257026   ;;  %vm452_vm6 = vcmask 259076  }
  0x18   :  { %v1698_v25 = vpack.c.bf16 %v140_v22, %v138_v21  ;;  %v144_v31 = vld [vmem:[#allocation3 + $0x58] sm:$0xff]  ;;  %v143_v34 = vld [vmem:[#allocation3 + $0x50] sm:$0xff]  ;;  %v146_v36 = vld [vmem:[#allocation3 + $0x68] sm:$0xff]  ;;  %vm586_vm7 = vcmask 261126   ;;  %vm1615_vm8 = vmmov 0   ;;  %vm1226_vm9 = vcmask 261120  }
  0x19   :  { %1354 = vmatprep.subr.bf16.mxu1 %v1691_v19  ;;  %1370 = vmatprep.subr.bf16.mxu0 %v1691_v19  ;;  %v1711_v32 = vpack.c.bf16 %v144_v31, %v142_v30  ;;  %v1713_v35 = vpack.c.bf16 %v143_v34, %v141_v33  ;;  %v148_v37 = vld [vmem:[#allocation3 + $0x78] sm:$0xff]  ;;  %v145_v39 = vld [vmem:[#allocation3 + $0x60] sm:$0xff]  ;;  %v147_v40 = vld [vmem:[#allocation3 + $0x70] sm:$0xff] }
  0x1a   :  { %1356 = vmatpush1.bf16.msra.mxu1 %v1696_v24  ;;  %1372 = vmatpush1.bf16.msra.mxu0 %v1696_v24  ;;  %v1719_v38 = vpack.c.bf16 %v148_v37, %v146_v36  ;;  %v1721_v41 = vpack.c.bf16 %v147_v40, %v145_v39  ;;  %v1744_v46 = vld [vmem:[%s1918_s4] ss:$0 sm:$0xff] }
  0x1b   :  { %1358 = vmatprep.subr.bf16.mxu1 %v1698_v25  ;;  %1374 = vmatprep.subr.bf16.mxu0 %v1698_v25 }
  0x1e   :  { %1360 = vmatpush1.bf16.msra.mxu1 %v1703_v28  ;;  %1376 = vmatpush1.bf16.msra.mxu0 %v1703_v28 }
  0x1f   :  { %1362 = vmatprep.subr.bf16.mxu1 %v1711_v32  ;;  %1378 = vmatprep.subr.bf16.mxu0 %v1711_v32 }
  0x22   :  { %1364 = vmatpush1.bf16.msra.mxu1 %v1713_v35  ;;  %1380 = vmatpush1.bf16.msra.mxu0 %v1713_v35 }
  0x23   :  { %1366 = vmatprep.subr.bf16.mxu1 %v1719_v38  ;;  %1382 = vmatprep.subr.bf16.mxu0 %v1719_v38 }
  0x26   :  { %1368 = vmatpush1.bf16.msra.mxu1 %v1721_v41  ;;  %1384 = vmatpush1.bf16.msra.mxu0 %v1721_v41 }
  0x27   :  { %1386 = vmatprep.subr.bf16.mxu1 %v1691_v19  ;;  %1402 = vmatprep.subr.bf16.mxu0 %v1691_v19 }
  0xe9   :  { %v1341_v4 = vpop.f32.mrb[0].mxu0 }
  0xea   :  { %v1681_v5 = vadd.f32 %v1341_v4, %v1315_v3  ;;  %v124_v6 = vpop.f32.mrb[1].mxu0 }
  0xeb   :  { %v1683_v7 = vadd.f32 %v1315_v3, %v124_v6 }
  0xed   :  { %1496 = vtanh.f32 %v1683_v7 }
  0xf7   :  { %v1497_v8 = vpop.eup %1496 }
  0xf8   :  { %157 = vrot.lane.b32.xlu0 %v1497_v8, %s1611_s1  ;;  %v153_v9 = vadd.f32 1.0, %v1497_v8 }
  0xfa   :  { %v154_v10 = vmul.f32 0.5, %v153_v9 }
  0xfc   :  { %v155_v13 = vmul.f32 0.0, %v154_v10 }
 0x16a   :  { %v158_v11 = vpop.permute.xlu0 %157 }
 0x16b   :  { %v160_v12 = vmul.f32 %v158_v11, %v154_v10 }
 0x16d   :  { %162 = vrot.lane.b32.xlu0 %v160_v12, %s1612_s0 }
 0x1df   :  { %v163_v14 = vpop.permute.xlu0 %162 }
 0x1e0   :  { %v1688_v15 = vadd.f32 %v163_v14, %v155_v13 }
 0x1e2   :  { %1498 = vtanh.f32 %v1688_v15  ;;  %v295_v63 = vrot.slane %v1688_v15, 6 }
 0x1ec   :  { %v1499_v29 = vpop.eup %1498 }
 0x1ed   :  { %168 = vrot.lane.b32.xlu1 %v1499_v29, %s1611_s1 }
 0x25f   :  { %v169_v42 = vpop.permute.xlu1 %168 }
 0x260   :  { %v171_v43 = vmul.f32 %v169_v42, %v154_v10 }
 0x262   :  { %173 = vrot.lane.b32.xlu1 %v171_v43, %s1612_s0 }
 0x2d4   :  { %v174_v44 = vpop.permute.xlu1 %173 }
 0x2d5   :  { %177 = vst.msk [vmem:[#allocation2] sm:$0x3] %vm176_vm2, %v174_v44 }
 0x2dc   :  { %v178_v45 = vld [vmem:[#allocation2] sm:$0x3] }
 0x2dd   :  { %1318 = vmatmul.mubr.msk.f32.vlgmr.msra.gmra.mrb[0].mxu1 %vm179_vm3, %v178_v45 }
 0x2de   :  { %1388 = vmatpush1.bf16.msra.mxu1 %v1696_v24  ;;  %522 = vmatprep.mubr.f32.mxu1 %v1613_v23 }
 0x2df   :  { %1390 = vmatprep.subr.bf16.mxu1 %v1698_v25 }
 0x2e2   :  { %1392 = vmatpush1.bf16.msra.mxu1 %v1703_v28 }
 0x2e3   :  { %1394 = vmatprep.subr.bf16.mxu1 %v1711_v32 }
 0x2e6   :  { %1396 = vmatpush1.bf16.msra.mxu1 %v1713_v35 }
 0x2e7   :  { %1398 = vmatprep.subr.bf16.mxu1 %v1719_v38 }
 0x2ea   :  { %1400 = vmatpush1.bf16.msra.mxu1 %v1721_v41 }
 0x2eb   :  { %1418 = vmatprep.subr.bf16.mxu1 %v1691_v19 }
 0x3b0   :  { %v249_v47 = vpop.f32.mrb[0].mxu1 }
 0x3b1   :  { %v260_v48 = vadd.f32 %v1744_v46, %v249_v47  ;;  %v251_v49 = vpop.f32.mrb[1].mxu1 }
 0x3b2   :  { %v288_v50 = vrot.slane %v251_v49, 6 }
 0x3b3   :  { %1500 = vtanh.f32 %v260_v48 }
 0x3b4   :  { %v290_v51 = vadd.f32 %v288_v50, %v1683_v7 }
 0x3b6   :  { %1502 = vtanh.f32 %v290_v51 }
 0x3bd   :  { %v1501_v52 = vpop.eup %1500 }
 0x3be   :  { %266 = vrot.lane.b32.xlu0 %v1501_v52, %s1611_s1  ;;  %v262_v54 = vadd.f32 1.0, %v1501_v52 }
 0x3c0   :  { %v1503_v53 = vpop.eup %1502  ;;  %v263_v56 = vmul.f32 0.5, %v262_v54 }
 0x3c1   :  { %299 = vrot.lane.b32.xlu1 %v1503_v53, %s1611_s1  ;;  %v292_v55 = vadd.f32 1.0, %v1503_v53 }
 0x3c2   :  { %v264_v62 = vmul.f32 0.0, %v263_v56 }
 0x3c3   :  { %v293_v59 = vmul.f32 0.5, %v292_v55 }
 0x3c5   :  { %v297_v2 = vmul.f32 %v295_v63, %v293_v59 }
 0x430   :  { %v267_v57 = vpop.permute.xlu0 %266 }
 0x431   :  { %v269_v58 = vmul.f32 %v267_v57, %v263_v56 }
 0x433   :  { %271 = vrot.lane.b32.xlu0 %v269_v58, %s1612_s0  ;;  %v300_v60 = vpop.permute.xlu1 %299 }
 0x434   :  { %v302_v61 = vmul.f32 %v300_v60, %v293_v59 }
 0x436   :  { %304 = vrot.lane.b32.xlu1 %v302_v61, %s1612_s0 }
 0x4a5   :  { %v272_v0 = vpop.permute.xlu0 %271 }
 0x4a6   :  { %v274_v1 = vadd.f32 %v272_v0, %v264_v62 }
 0x4a8   :  { %1504 = vtanh.f32 %v274_v1  ;;  %v305_v3 = vpop.permute.xlu1 %304 }
 0x4a9   :  { %v307_v4 = vadd.f32 %v305_v3, %v297_v2 }
 0x4ab   :  { %1506 = vtanh.f32 %v307_v4  ;;  %v429_v40 = vrot.slane %v307_v4, 6 }
 0x4b2   :  { %v1505_v6 = vpop.eup %1504 }
 0x4b3   :  { %277 = vrot.lane.b32.xlu0 %v1505_v6, %s1611_s1 }
 0x4b5   :  { %v1507_v8 = vpop.eup %1506 }
 0x4b6   :  { %310 = vrot.lane.b32.xlu1 %v1507_v8, %s1611_s1 }
 0x525   :  { %v278_v9 = vpop.permute.xlu0 %277 }
 0x526   :  { %v280_v10 = vmul.f32 %v278_v9, %v263_v56 }
 0x528   :  { %282 = vrot.lane.b32.xlu0 %v280_v10, %s1611_s1  ;;  %v311_v11 = vpop.permute.xlu1 %310 }
 0x529   :  { %v313_v12 = vmul.f32 %v311_v11, %v293_v59 }
 0x52b   :  { %315 = vrot.lane.b32.xlu1 %v313_v12, %s1612_s0 }
 0x59a   :  { %v283_v13 = vpop.permute.xlu0 %282 }
 0x59b   :  { %286 = vst.msk [vmem:[#allocation2] sm:$0x3] %vm285_vm4, %v283_v13 }
 0x59d   :  { %v316_v14 = vpop.permute.xlu1 %315 }
 0x59e   :  { %319 = vst.msk [vmem:[#allocation2 - $0x2] sm:$0xc] %vm318_vm5, %v316_v14 }
 0x5a5   :  { %v320_v15 = vld [vmem:[#allocation2] sm:$0x3] }
 0x5a6   :  { %1320 = vmatmul.mubr.msk.f32.vlgmr.msra.gmra.mrb[2].mxu0 %vm179_vm3, %v320_v15 }
 0x5a7   :  { %1404 = vmatpush1.bf16.msra.mxu0 %v1696_v24  ;;  %656 = vmatprep.mubr.f32.mxu0 %v1613_v23 }
 0x5a8   :  { %1406 = vmatprep.subr.bf16.mxu0 %v1698_v25 }
 0x5ab   :  { %1408 = vmatpush1.bf16.msra.mxu0 %v1703_v28 }
 0x5ac   :  { %1410 = vmatprep.subr.bf16.mxu0 %v1711_v32 }
 0x5af   :  { %1412 = vmatpush1.bf16.msra.mxu0 %v1713_v35 }
 0x5b0   :  { %1414 = vmatprep.subr.bf16.mxu0 %v1719_v38 }
 0x5b3   :  { %1416 = vmatpush1.bf16.msra.mxu0 %v1721_v41 }
 0x5b4   :  { %1434 = vmatprep.subr.bf16.mxu0 %v1691_v19 }
 0x679   :  { %v390_v16 = vpop.f32.mrb[2].mxu0 }
 0x67a   :  { %v395_v17 = vadd.f32 %v1744_v46, %v390_v16  ;;  %v392_v18 = vpop.f32.mrb[3].mxu0 }
 0x67b   :  { %v422_v20 = vrot.slane %v392_v18, 4 }
 0x67c   :  { %1508 = vtanh.f32 %v395_v17 }
 0x67d   :  { %v424_v21 = vadd.f32 %v422_v20, %v1683_v7 }
 0x67f   :  { %1510 = vtanh.f32 %v424_v21 }
 0x686   :  { %v1509_v22 = vpop.eup %1508 }
 0x687   :  { %401 = vrot.lane.b32.xlu0 %v1509_v22, %s1611_s1  ;;  %v397_v27 = vadd.f32 1.0, %v1509_v22 }
 0x689   :  { %v1511_v26 = vpop.eup %1510  ;;  %v398_v30 = vmul.f32 0.5, %v397_v27 }
 0x68a   :  { %433 = vrot.lane.b32.xlu1 %v1511_v26, %s1611_s1  ;;  %v426_v29 = vadd.f32 1.0, %v1511_v26 }
 0x68b   :  { %v399_v39 = vmul.f32 %v398_v30, %v274_v1 }
 0x68c   :  { %v427_v34 = vmul.f32 0.5, %v426_v29 }
 0x68e   :  { %v431_v44 = vmul.f32 %v429_v40, %v427_v34 }
 0x6f9   :  { %v402_v31 = vpop.permute.xlu0 %401 }
 0x6fa   :  { %v404_v33 = vmul.f32 %v402_v31, %v398_v30 }
 0x6fc   :  { %406 = vrot.lane.b32.xlu0 %v404_v33, %s1612_s0  ;;  %v434_v36 = vpop.permute.xlu1 %433 }
 0x6fd   :  { %v436_v37 = vmul.f32 %v434_v36, %v427_v34 }
 0x6ff   :  { %438 = vrot.lane.b32.xlu1 %v436_v37, %s1612_s0 }
 0x76e   :  { %v407_v42 = vpop.permute.xlu0 %406 }
 0x76f   :  { %v409_v43 = vadd.f32 %v407_v42, %v399_v39 }
 0x771   :  { %1512 = vtanh.f32 %v409_v43  ;;  %v439_v45 = vpop.permute.xlu1 %438 }
 0x772   :  { %v441_v47 = vadd.f32 %v439_v45, %v431_v44 }
 0x774   :  { %1514 = vtanh.f32 %v441_v47  ;;  %v563_v10 = vrot.slane %v441_v47, 6 }
 0x77b   :  { %v1513_v48 = vpop.eup %1512 }
 0x77c   :  { %412 = vrot.lane.b32.xlu0 %v1513_v48, %s1611_s1 }
 0x77e   :  { %v1515_v49 = vpop.eup %1514 }
 0x77f   :  { %444 = vrot.lane.b32.xlu1 %v1515_v49, %s1611_s1 }
 0x7ee   :  { %v413_v50 = vpop.permute.xlu0 %412 }
 0x7ef   :  { %v415_v51 = vmul.f32 %v413_v50, %v398_v30 }
 0x7f1   :  { %417 = vrot.lane.b32.xlu0 %v415_v51, %s1611_s1  ;;  %v445_v52 = vpop.permute.xlu1 %444 }
 0x7f2   :  { %v447_v53 = vmul.f32 %v445_v52, %v427_v34 }
 0x7f4   :  { %449 = vrot.lane.b32.xlu1 %v447_v53, %s1612_s0 }
 0x863   :  { %v418_v54 = vpop.permute.xlu0 %417 }
 0x864   :  { %420 = vst.msk [vmem:[#allocation2] sm:$0x3] %vm285_vm4, %v418_v54 }
 0x866   :  { %v450_v55 = vpop.permute.xlu1 %449 }
 0x867   :  { %453 = vst.msk [vmem:[#allocation2 - $0x4] sm:$0x30] %vm452_vm6, %v450_v55 }
 0x86e   :  { %v454_v56 = vld [vmem:[#allocation2] sm:$0x3] }
 0x86f   :  { %1321 = vmatmul.mubr.msk.f32.vlgmr.msra.gmra.mrb[2].mxu1 %vm179_vm3, %v454_v56 }
 0x870   :  { %1420 = vmatpush1.bf16.msra.mxu1 %v1696_v24  ;;  %786 = vmatprep.mubr.f32.mxu1 %v1613_v23 }
 0x871   :  { %1422 = vmatprep.subr.bf16.mxu1 %v1698_v25 }
 0x874   :  { %1424 = vmatpush1.bf16.msra.mxu1 %v1703_v28 }
 0x875   :  { %1426 = vmatprep.subr.bf16.mxu1 %v1711_v32 }
 0x878   :  { %1428 = vmatpush1.bf16.msra.mxu1 %v1713_v35 }
 0x879   :  { %1430 = vmatprep.subr.bf16.mxu1 %v1719_v38 }
 0x87c   :  { %1432 = vmatpush1.bf16.msra.mxu1 %v1721_v41 }
 0x87d   :  { %1450 = vmatprep.subr.bf16.mxu1 %v1691_v19 }
 0x942   :  { %v524_v57 = vpop.f32.mrb[2].mxu1 }
 0x943   :  { %v529_v58 = vadd.f32 %v1744_v46, %v524_v57  ;;  %v526_v59 = vpop.f32.mrb[3].mxu1 }
 0x944   :  { %v556_v60 = vrot.slane %v526_v59, 2 }
 0x945   :  { %1516 = vtanh.f32 %v529_v58 }
 0x946   :  { %v558_v61 = vadd.f32 %v556_v60, %v1683_v7 }
 0x948   :  { %1518 = vtanh.f32 %v558_v61 }
 0x94f   :  { %v1517_v62 = vpop.eup %1516 }
 0x950   :  { %535 = vrot.lane.b32.xlu0 %v1517_v62, %s1611_s1  ;;  %v531_v0 = vadd.f32 1.0, %v1517_v62 }
 0x952   :  { %v1519_v63 = vpop.eup %1518  ;;  %v532_v2 = vmul.f32 0.5, %v531_v0 }
 0x953   :  { %567 = vrot.lane.b32.xlu1 %v1519_v63, %s1611_s1  ;;  %v560_v1 = vadd.f32 1.0, %v1519_v63 }
 0x954   :  { %v533_v7 = vmul.f32 %v532_v2, %v409_v43 }
 0x955   :  { %v561_v6 = vmul.f32 0.5, %v560_v1 }
 0x957   :  { %v565_v13 = vmul.f32 %v563_v10, %v561_v6 }
 0x9c2   :  { %v536_v3 = vpop.permute.xlu0 %535 }
 0x9c3   :  { %v538_v4 = vmul.f32 %v536_v3, %v532_v2 }
 0x9c5   :  { %540 = vrot.lane.b32.xlu0 %v538_v4, %s1612_s0  ;;  %v568_v8 = vpop.permute.xlu1 %567 }
 0x9c6   :  { %v570_v9 = vmul.f32 %v568_v8, %v561_v6 }
 0x9c8   :  { %572 = vrot.lane.b32.xlu1 %v570_v9, %s1612_s0 }
 0xa37   :  { %v541_v11 = vpop.permute.xlu0 %540 }
 0xa38   :  { %v543_v12 = vadd.f32 %v541_v11, %v533_v7 }
 0xa3a   :  { %1520 = vtanh.f32 %v543_v12  ;;  %v573_v14 = vpop.permute.xlu1 %572 }
 0xa3b   :  { %v575_v15 = vadd.f32 %v573_v14, %v565_v13 }
 0xa3d   :  { %1522 = vtanh.f32 %v575_v15  ;;  %v694_v48 = vrot.slane %v575_v15, 6 }
 0xa44   :  { %v1521_v16 = vpop.eup %1520 }
 0xa45   :  { %546 = vrot.lane.b32.xlu0 %v1521_v16, %s1611_s1 }
 0xa47   :  { %v1523_v17 = vpop.eup %1522 }
 0xa48   :  { %578 = vrot.lane.b32.xlu1 %v1523_v17, %s1611_s1 }
 0xab7   :  { %v547_v18 = vpop.permute.xlu0 %546 }
 0xab8   :  { %v549_v20 = vmul.f32 %v547_v18, %v532_v2 }
 0xaba   :  { %551 = vrot.lane.b32.xlu0 %v549_v20, %s1611_s1  ;;  %v579_v21 = vpop.permute.xlu1 %578 }
 0xabb   :  { %v581_v22 = vmul.f32 %v579_v21, %v561_v6 }
 0xabd   :  { %583 = vrot.lane.b32.xlu1 %v581_v22, %s1612_s0 }
 0xb2c   :  { %v552_v26 = vpop.permute.xlu0 %551 }
 0xb2d   :  { %554 = vst.msk [vmem:[#allocation2] sm:$0x3] %vm285_vm4, %v552_v26 }
 0xb2f   :  { %v584_v27 = vpop.permute.xlu1 %583 }
 0xb30   :  { %587 = vst.msk [vmem:[#allocation2 - $0x6] sm:$0xc0] %vm586_vm7, %v584_v27 }
 0xb37   :  { %v588_v29 = vld [vmem:[#allocation2] sm:$0x3] }
 0xb38   :  { %1322 = vmatmul.mubr.msk.f32.vlgmr.msra.gmra.mrb[4].mxu0 %vm179_vm3, %v588_v29 }
 0xb39   :  { %1436 = vmatpush1.bf16.msra.mxu0 %v1696_v24  ;;  %919 = vmatprep.mubr.f32.mxu0 %v1613_v23 }
 0xb3a   :  { %1438 = vmatprep.subr.bf16.mxu0 %v1698_v25 }
 0xb3d   :  { %1440 = vmatpush1.bf16.msra.mxu0 %v1703_v28 }
 0xb3e   :  { %1442 = vmatprep.subr.bf16.mxu0 %v1711_v32 }
 0xb41   :  { %1444 = vmatpush1.bf16.msra.mxu0 %v1713_v35 }
 0xb42   :  { %1446 = vmatprep.subr.bf16.mxu0 %v1719_v38 }
 0xb45   :  { %1448 = vmatpush1.bf16.msra.mxu0 %v1721_v41 }
 0xb46   :  { %1466 = vmatprep.subr.bf16.mxu0 %v1691_v19 }
 0xc0b   :  { %v658_v30 = vpop.f32.mrb[4].mxu0 }
 0xc0c   :  { %v663_v31 = vadd.f32 %v1744_v46, %v658_v30  ;;  %v660_v33 = vpop.f32.mrb[5].mxu0 }
 0xc0d   :  { %v689_v34 = vadd.f32 %v660_v33, %v1681_v5 }
 0xc0e   :  { %1524 = vtanh.f32 %v663_v31 }
 0xc0f   :  { %1526 = vtanh.f32 %v689_v34 }
 0xc18   :  { %v1525_v36 = vpop.eup %1524 }
 0xc19   :  { %v1527_v37 = vpop.eup %1526  ;;  %669 = vrot.lane.b32.xlu0 %v1525_v36, %s1611_s1  ;;  %v665_v39 = vadd.f32 1.0, %v1525_v36 }
 0xc1a   :  { %698 = vrot.lane.b32.xlu1 %v1527_v37, %s1611_s1  ;;  %v691_v40 = vadd.f32 1.0, %v1527_v37 }
 0xc1b   :  { %v666_v42 = vmul.f32 0.5, %v665_v39 }
 0xc1c   :  { %v692_v44 = vmul.f32 0.5, %v691_v40 }
 0xc1d   :  { %v667_v49 = vmul.f32 %v666_v42, %v543_v12 }
 0xc1e   :  { %v696_v51 = vmul.f32 %v694_v48, %v692_v44 }
 0xc8b   :  { %v670_v43 = vpop.permute.xlu0 %669 }
 0xc8c   :  { %v672_v19 = vmul.f32 %v670_v43, %v666_v42  ;;  %v699_v45 = vpop.permute.xlu1 %698 }
 0xc8d   :  { %v701_v47 = vmul.f32 %v699_v45, %v692_v44 }
 0xc8e   :  { %674 = vrot.lane.b32.xlu0 %v672_v19, %s1612_s0 }
 0xc8f   :  { %703 = vrot.lane.b32.xlu1 %v701_v47, %s1612_s0 }
 0xd00   :  { %v675_v50 = vpop.permute.xlu0 %674 }
 0xd01   :  { %v677_v52 = vadd.f32 %v675_v50, %v667_v49  ;;  %v704_v53 = vpop.permute.xlu1 %703 }
 0xd02   :  { %v706_v54 = vadd.f32 %v704_v53, %v696_v51 }
 0xd03   :  { %1528 = vtanh.f32 %v677_v52 }
 0xd04   :  { %1530 = vtanh.f32 %v706_v54  ;;  %v827_v17 = vrot.slane %v706_v54, 6 }
 0xd0d   :  { %v1529_v55 = vpop.eup %1528 }
 0xd0e   :  { %v1531_v56 = vpop.eup %1530  ;;  %680 = vrot.lane.b32.xlu0 %v1529_v55, %s1611_s1 }
 0xd0f   :  { %709 = vrot.lane.b32.xlu1 %v1531_v56, %s1611_s1 }
 0xd80   :  { %v681_v57 = vpop.permute.xlu0 %680 }
 0xd81   :  { %v683_v58 = vmul.f32 %v681_v57, %v666_v42  ;;  %v710_v59 = vpop.permute.xlu1 %709 }
 0xd82   :  { %v712_v60 = vmul.f32 %v710_v59, %v692_v44 }
 0xd83   :  { %685 = vrot.lane.b32.xlu0 %v683_v58, %s1611_s1 }
 0xd84   :  { %714 = vrot.lane.b32.xlu1 %v712_v60, %s1612_s0 }
 0xdf5   :  { %v686_v61 = vpop.permute.xlu0 %685 }
 0xdf6   :  { %688 = vst.msk [vmem:[#allocation2] sm:$0x3] %vm285_vm4, %v686_v61  ;;  %v715_v62 = vpop.permute.xlu1 %714 }
 0xdf7   :  { %717 = vst.msk [vmem:[#allocation2] sm:$0x3] %vm176_vm2, %v715_v62 }
 0xdfe   :  { %v718_v63 = vld [vmem:[#allocation2] sm:$0x3] }
 0xdff   :  { %1323 = vmatmul.mubr.msk.f32.vlgmr.msra.gmra.mrb[4].mxu1 %vm179_vm3, %v718_v63 }
 0xe00   :  { %1452 = vmatpush1.bf16.msra.mxu1 %v1696_v24  ;;  %1052 = vmatprep.mubr.f32.mxu1 %v1613_v23 }
 0xe01   :  { %1454 = vmatprep.subr.bf16.mxu1 %v1698_v25 }
 0xe04   :  { %1456 = vmatpush1.bf16.msra.mxu1 %v1703_v28 }
 0xe05   :  { %1458 = vmatprep.subr.bf16.mxu1 %v1711_v32 }
 0xe08   :  { %1460 = vmatpush1.bf16.msra.mxu1 %v1713_v35 }
 0xe09   :  { %1462 = vmatprep.subr.bf16.mxu1 %v1719_v38 }
 0xe0c   :  { %1464 = vmatpush1.bf16.msra.mxu1 %v1721_v41 }
 0xed2   :  { %v788_v0 = vpop.f32.mrb[4].mxu1 }
 0xed3   :  { %v793_v1 = vadd.f32 %v1744_v46, %v788_v0  ;;  %v790_v2 = vpop.f32.mrb[5].mxu1 }
 0xed4   :  { %v820_v3 = vrot.slane %v790_v2, 6 }
 0xed5   :  { %1532 = vtanh.f32 %v793_v1 }
 0xed6   :  { %v822_v4 = vadd.f32 %v820_v3, %v1681_v5 }
 0xed8   :  { %1534 = vtanh.f32 %v822_v4 }
 0xedf   :  { %v1533_v6 = vpop.eup %1532 }
 0xee0   :  { %799 = vrot.lane.b32.xlu0 %v1533_v6, %s1611_s1  ;;  %v795_v9 = vadd.f32 1.0, %v1533_v6 }
 0xee2   :  { %v1535_v8 = vpop.eup %1534  ;;  %v796_v10 = vmul.f32 0.5, %v795_v9 }
 0xee3   :  { %831 = vrot.lane.b32.xlu1 %v1535_v8, %s1611_s1  ;;  %v824_v7 = vadd.f32 1.0, %v1535_v8 }
 0xee4   :  { %v797_v16 = vmul.f32 %v796_v10, %v677_v52 }
 0xee5   :  { %v825_v13 = vmul.f32 0.5, %v824_v7 }
 0xee7   :  { %v829_v21 = vmul.f32 %v827_v17, %v825_v13 }
 0xf52   :  { %v800_v11 = vpop.permute.xlu0 %799 }
 0xf53   :  { %v802_v12 = vmul.f32 %v800_v11, %v796_v10 }
 0xf55   :  { %804 = vrot.lane.b32.xlu0 %v802_v12, %s1612_s0  ;;  %v832_v14 = vpop.permute.xlu1 %831 }
 0xf56   :  { %v834_v15 = vmul.f32 %v832_v14, %v825_v13 }
 0xf58   :  { %836 = vrot.lane.b32.xlu1 %v834_v15, %s1612_s0 }
 0xfc7   :  { %v805_v18 = vpop.permute.xlu0 %804 }
 0xfc8   :  { %v807_v20 = vadd.f32 %v805_v18, %v797_v16 }
 0xfca   :  { %1536 = vtanh.f32 %v807_v20  ;;  %v837_v22 = vpop.permute.xlu1 %836 }
 0xfcb   :  { %v839_v26 = vadd.f32 %v837_v22, %v829_v21 }
 0xfcd   :  { %1538 = vtanh.f32 %v839_v26  ;;  %v960_v50 = vrot.slane %v839_v26, 6 }
 0xfd4   :  { %v1537_v27 = vpop.eup %1536 }
 0xfd5   :  { %810 = vrot.lane.b32.xlu0 %v1537_v27, %s1611_s1 }
 0xfd7   :  { %v1539_v29 = vpop.eup %1538 }
 0xfd8   :  { %842 = vrot.lane.b32.xlu1 %v1539_v29, %s1611_s1 }
0x1047   :  { %v811_v30 = vpop.permute.xlu0 %810 }
0x1048   :  { %v813_v31 = vmul.f32 %v811_v30, %v796_v10 }
0x104a   :  { %815 = vrot.lane.b32.xlu0 %v813_v31, %s1611_s1  ;;  %v843_v33 = vpop.permute.xlu1 %842 }
0x104b   :  { %v845_v34 = vmul.f32 %v843_v33, %v825_v13 }
0x104d   :  { %847 = vrot.lane.b32.xlu1 %v845_v34, %s1612_s0 }
0x10bc   :  { %v816_v36 = vpop.permute.xlu0 %815 }
0x10bd   :  { %818 = vst.msk [vmem:[#allocation2] sm:$0x3] %vm285_vm4, %v816_v36 }
0x10bf   :  { %v848_v37 = vpop.permute.xlu1 %847 }
0x10c0   :  { %850 = vst.msk [vmem:[#allocation2 - $0x2] sm:$0xc] %vm318_vm5, %v848_v37 }
0x10c7   :  { %v851_v39 = vld [vmem:[#allocation2] sm:$0x3] }
0x10c8   :  { %1324 = vmatmul.mubr.msk.f32.vlgmr.msra.gmra.mrb[6].mxu0 %vm179_vm3, %v851_v39 }
0x10c9   :  { %1468 = vmatpush1.bf16.msra.mxu0 %v1696_v24  ;;  %1185 = vmatprep.mubr.f32.mxu0 %v1613_v23 }
0x10ca   :  { %1470 = vmatprep.subr.bf16.mxu0 %v1698_v25 }
0x10cd   :  { %1472 = vmatpush1.bf16.msra.mxu0 %v1703_v28 }
0x10ce   :  { %1474 = vmatprep.subr.bf16.mxu0 %v1711_v32 }
0x10d1   :  { %1476 = vmatpush1.bf16.msra.mxu0 %v1713_v35 }
0x10d2   :  { %1478 = vmatprep.subr.bf16.mxu0 %v1719_v38 }
0x10d5   :  { %1480 = vmatpush1.bf16.msra.mxu0 %v1721_v41 }
0x119b   :  { %v921_v40 = vpop.f32.mrb[6].mxu0 }
0x119c   :  { %v926_v42 = vadd.f32 %v1744_v46, %v921_v40  ;;  %v923_v43 = vpop.f32.mrb[7].mxu0 }
0x119d   :  { %v953_v44 = vrot.slane %v923_v43, 4 }
0x119e   :  { %1540 = vtanh.f32 %v926_v42 }
0x119f   :  { %v955_v24 = vadd.f32 %v953_v44, %v1681_v5 }
0x11a1   :  { %1542 = vtanh.f32 %v955_v24 }
0x11a8   :  { %v1541_v25 = vpop.eup %1540 }
0x11a9   :  { %932 = vrot.lane.b32.xlu0 %v1541_v25, %s1611_s1  ;;  %v928_v32 = vadd.f32 1.0, %v1541_v25 }
0x11ab   :  { %v1543_v28 = vpop.eup %1542  ;;  %v929_v38 = vmul.f32 0.5, %v928_v32 }
0x11ac   :  { %964 = vrot.lane.b32.xlu1 %v1543_v28, %s1611_s1  ;;  %v957_v35 = vadd.f32 1.0, %v1543_v28 }
0x11ad   :  { %v930_v49 = vmul.f32 %v929_v38, %v807_v20 }
0x11ae   :  { %v958_v45 = vmul.f32 0.5, %v957_v35 }
0x11b0   :  { %v962_v53 = vmul.f32 %v960_v50, %v958_v45 }
0x121b   :  { %v933_v19 = vpop.permute.xlu0 %932 }
0x121c   :  { %v935_v41 = vmul.f32 %v933_v19, %v929_v38 }
0x121e   :  { %937 = vrot.lane.b32.xlu0 %v935_v41, %s1612_s0  ;;  %v965_v47 = vpop.permute.xlu1 %964  ;;  %v1212_v41 = vld [vmem:[%s1919_s5] sm:$0xff] }
0x121f   :  { %v967_v48 = vmul.f32 %v965_v47, %v958_v45  ;;  %v1614_v47 = vmov 0.0|0.0  }
0x1220   :  { %1481 = vmatprep.subr.bf16.mxu1 %v1614_v47 }
0x1221   :  { %969 = vrot.lane.b32.xlu1 %v967_v48, %s1612_s0 }
0x1290   :  { %v938_v51 = vpop.permute.xlu0 %937 }
0x1291   :  { %v940_v52 = vadd.f32 %v938_v51, %v930_v49  ;;  %v1215_v49 = vld [vmem:[%s1919_s5 + $0x18] sm:$0xff] }
0x1293   :  { %1544 = vtanh.f32 %v940_v52  ;;  %v970_v54 = vpop.permute.xlu1 %969 }
0x1294   :  { %v972_v55 = vadd.f32 %v970_v54, %v962_v53 }
0x1296   :  { %1546 = vtanh.f32 %v972_v55  ;;  %v1093_v17 = vrot.slane %v972_v55, 6  ;;  %v1327_v55 = vld [vmem:[%s1920_s6] ss:$0 sm:$0xff] }
0x129d   :  { %v1545_v56 = vpop.eup %1544 }
0x129e   :  { %943 = vrot.lane.b32.xlu0 %v1545_v56, %s1611_s1 }
0x12a0   :  { %v1547_v57 = vpop.eup %1546 }
0x12a1   :  { %975 = vrot.lane.b32.xlu1 %v1547_v57, %s1611_s1 }
0x1310   :  { %v944_v58 = vpop.permute.xlu0 %943 }
0x1311   :  { %v946_v59 = vmul.f32 %v944_v58, %v929_v38 }
0x1313   :  { %948 = vrot.lane.b32.xlu0 %v946_v59, %s1611_s1  ;;  %v976_v60 = vpop.permute.xlu1 %975 }
0x1314   :  { %v978_v61 = vmul.f32 %v976_v60, %v958_v45  ;;  %v1214_v45 = vld [vmem:[%s1919_s5 + $0x10] sm:$0xff] }
0x1315   :  { %v1485_v50 = vpack.c.bf16 %v1215_v49, %v1214_v45 }
0x1316   :  { %980 = vrot.lane.b32.xlu1 %v978_v61, %s1612_s0 }
0x1385   :  { %v949_v62 = vpop.permute.xlu0 %948 }
0x1386   :  { %951 = vst.msk [vmem:[#allocation2] sm:$0x3] %vm285_vm4, %v949_v62 }
0x1388   :  { %v981_v63 = vpop.permute.xlu1 %980 }
0x1389   :  { %983 = vst.msk [vmem:[#allocation2 - $0x4] sm:$0x30] %vm452_vm6, %v981_v63 }
0x1390   :  { %v984_v0 = vld [vmem:[#allocation2] sm:$0x3] }
0x1391   :  { %1325 = vmatmul.mubr.msk.f32.vlgmr.msra.gmra.mrb[6].mxu1 %vm179_vm3, %v984_v0 }
0x1392   :  { %1350 = vmatprep.mubr.msk.f32.mxu1 %vm1615_vm8, %v1613_v23 }
0x1464   :  { %v1054_v1 = vpop.f32.mrb[6].mxu1 }
0x1465   :  { %v1059_v2 = vadd.f32 %v1744_v46, %v1054_v1  ;;  %v1056_v3 = vpop.f32.mrb[7].mxu1 }
0x1466   :  { %v1086_v4 = vrot.slane %v1056_v3, 2 }
0x1467   :  { %1548 = vtanh.f32 %v1059_v2 }
0x1468   :  { %v1088_v6 = vadd.f32 %v1086_v4, %v1681_v5 }
0x146a   :  { %1550 = vtanh.f32 %v1088_v6 }
0x1471   :  { %v1549_v8 = vpop.eup %1548 }
0x1472   :  { %1065 = vrot.lane.b32.xlu0 %v1549_v8, %s1611_s1  ;;  %v1061_v7 = vadd.f32 1.0, %v1549_v8 }
0x1474   :  { %v1551_v9 = vpop.eup %1550  ;;  %v1062_v11 = vmul.f32 0.5, %v1061_v7 }
0x1475   :  { %1097 = vrot.lane.b32.xlu1 %v1551_v9, %s1611_s1  ;;  %v1090_v10 = vadd.f32 1.0, %v1551_v9 }
0x1476   :  { %v1063_v5 = vmul.f32 %v1062_v11, %v940_v52 }
0x1477   :  { %v1091_v14 = vmul.f32 0.5, %v1090_v10 }
0x1479   :  { %v1095_v21 = vmul.f32 %v1093_v17, %v1091_v14 }
0x14e4   :  { %v1066_v12 = vpop.permute.xlu0 %1065 }
0x14e5   :  { %v1068_v13 = vmul.f32 %v1066_v12, %v1062_v11 }
0x14e7   :  { %1070 = vrot.lane.b32.xlu0 %v1068_v13, %s1612_s0  ;;  %v1098_v15 = vpop.permute.xlu1 %1097 }
0x14e8   :  { %v1100_v16 = vmul.f32 %v1098_v15, %v1091_v14 }
0x14ea   :  { %1102 = vrot.lane.b32.xlu1 %v1100_v16, %s1612_s0 }
0x1559   :  { %v1071_v18 = vpop.permute.xlu0 %1070 }
0x155a   :  { %v1073_v20 = vadd.f32 %v1071_v18, %v1063_v5 }
0x155c   :  { %1552 = vtanh.f32 %v1073_v20  ;;  %v1103_v22 = vpop.permute.xlu1 %1102 }
0x155d   :  { %v1105_v26 = vadd.f32 %v1103_v22, %v1095_v21 }
0x155f   :  { %1554 = vtanh.f32 %v1105_v26 }
0x1566   :  { %v1553_v27 = vpop.eup %1552 }
0x1567   :  { %1076 = vrot.lane.b32.xlu0 %v1553_v27, %s1611_s1 }
0x1569   :  { %v1555_v29 = vpop.eup %1554 }
0x156a   :  { %1108 = vrot.lane.b32.xlu1 %v1555_v29, %s1611_s1 }
0x15d9   :  { %v1077_v30 = vpop.permute.xlu0 %1076 }
0x15da   :  { %v1079_v31 = vmul.f32 %v1077_v30, %v1062_v11 }
0x15dc   :  { %1081 = vrot.lane.b32.xlu0 %v1079_v31, %s1611_s1  ;;  %v1109_v33 = vpop.permute.xlu1 %1108 }
0x15dd   :  { %v1111_v34 = vmul.f32 %v1109_v33, %v1091_v14 }
0x15df   :  { %1113 = vrot.lane.b32.xlu1 %v1111_v34, %s1612_s0 }
0x164e   :  { %v1082_v36 = vpop.permute.xlu0 %1081 }
0x164f   :  { %1084 = vst.msk [vmem:[#allocation2] sm:$0x3] %vm285_vm4, %v1082_v36 }
0x1651   :  { %v1114_v37 = vpop.permute.xlu1 %1113 }
0x1652   :  { %1116 = vst.msk [vmem:[#allocation2 - $0x6] sm:$0xc0] %vm586_vm7, %v1114_v37 }
0x1659   :  { %v1117_v39 = vld [vmem:[#allocation2] sm:$0x3] }
0x165a   :  { %1326 = vmatmul.mubr.msk.f32.vlgmr.msra.gmra.mrb[8].mxu0 %vm179_vm3, %v1117_v39 }
0x172d   :  { %v1187_v40 = vpop.f32.mrb[8].mxu0 }
0x172e   :  { %v1191_v42 = vadd.f32 %v1744_v46, %v1187_v40  ;;  %v1189_v43 = vpop.f32.mrb[9].mxu0  ;;  %v1213_v46 = vld [vmem:[%s1919_s5 + $0x8] sm:$0xff]  ;;  %s1616_s5 = smov [#allocation6]  }
0x172f   :  { %v1482_v48 = vpack.c.bf16 %v1213_v46, %v1212_v41  ;;  %s1306_s9 = sshll.u32 %s1616_s5, 4  ;;  %s1307_s9 = int_to_ptr.vmem [resolvable:$true] %s1306_s9 }
0x1730   :  { %1556 = vtanh.f32 %v1191_v42  ;;  %s1582_s10 = scalar_lea.vmem %s1307_s9, 32  ;;  %p1587_p9 = scmp.lt.s32.totalorder %s1307_s9, %s1307_s9 }
0x1731   :  { %1483 = vmatpush3.bf16.msra.mxu1 %v1482_v48  ;;  %p1583_p8 = scmp.ne.s32.totalorder %s1307_s9, %s1582_s10  ;;  %p1588_p10 = scmp.lt.s32.totalorder %s1582_s10, %s1582_s10 }
0x1732   :  { %1484 = vmatprep.subr.bf16.mxu1 %v1614_v47 }
0x1733   :  { %p1589_p11 = por %p1588_p10, %p1587_p9 }
0x1735   :  { %1486 = vmatpush3.bf16.msra.mxu1 %v1485_v50  ;;  %p1590_p12 = pnand %p1589_p11, %p1583_p8 }
0x173a   :  { %v1557_v44 = vpop.eup %1556 }
0x173b   :  { %1197 = vrot.lane.b32.xlu0 %v1557_v44, %s1611_s1  ;;  %v1193_v24 = vadd.f32 1.0, %v1557_v44 }
0x173d   :  { %v1194_v25 = vmul.f32 0.5, %v1193_v24 }
0x173f   :  { %v1195_v35 = vmul.f32 %v1194_v25, %v1073_v20 }
0x17ad   :  { %v1198_v28 = vpop.permute.xlu0 %1197 }
0x17ae   :  { %v1200_v32 = vmul.f32 %v1198_v28, %v1194_v25 }
0x17b0   :  { %1202 = vrot.lane.b32.xlu1 %v1200_v32, %s1612_s0 }
0x1822   :  { %v1203_v38 = vpop.permute.xlu1 %1202 }
0x1823   :  { %v1205_v19 = vadd.f32 %v1203_v38, %v1195_v35 }
0x1825   :  { %1558 = vtanh.f32 %v1205_v19 }
0x182f   :  { %v1559_v51 = vpop.eup %1558 }
0x1830   :  { %1208 = vrot.lane.b32.xlu0 %v1559_v51, %s1611_s1 }
0x18a2   :  { %v1209_v52 = vpop.permute.xlu0 %1208 }
0x18a3   :  { %v1211_v53 = vmul.f32 %v1209_v52, %v1194_v25 }
0x18a5   :  { %1224 = vrot.lane.b32.xlu1 %v1211_v53, %s1612_s0 }
0x1917   :  { %v1225_v54 = vpop.permute.xlu1 %1224 }
0x1918   :  { %1351 = vmatmul.mubr.msk.f32.vlgmr.msra.gmra.mrb[8].mxu1 %vm1226_vm9, %v1225_v54 }
0x19eb   :  { %v1295_v23 = vpop.f32.mrb[8].mxu1 }
0x19ec   :  { %v1296_v56 = vadd.f32 %v1327_v55, %v1295_v23  ;;  %v1352_v57 = vpop.f32.mrb[9].mxu1 }
0x19ee   :  { %1299 = vst [vmem:[#allocation6] sm:$0x3] %v1296_v56 }
0x19ef   :  { %1593 = shalt.err (!%p1590_p12)
}
0x19f0   :  { %s1594_s13 = scalar_lea.hbm %s1921_s7, 32 }
0x19f1   :  { %p1595_p13 = scmp.ne.s32.totalorder %s1921_s7, %s1594_s13  ;;  %p1598_p0 = scmp.lt.u32.totalorder %s1594_s13, %s1921_s7 }
0x19f3   :  { %p1600_p1 = pnand %p1598_p0, %p1595_p13 }
0x19f5   :  { %1603 = shalt.err (!%p1600_p1)
}
0x19f6   :  { %1309 = dma.vmem_to_hbm [thread:$0]  %s1307_s9, 32, %s1921_s7, [#allocation5]  }
0x19f7   :  { %1606 = dma.done.wait [#allocation5], 32  }
0x19f8   :  { %1607 = vsyncadd [#allocation5], 4294967264 }
0x19f9   :  { %1313 = vsyncpa [#allocation4], 1 }
0x19fa   :  { %1314 = vsyncpa [#allocation5], 1 }

</bundles_post_ra>
